<compile_context>
chip_gen: v5e
topology: v5e:2x2
jax: 0.10.0
libtpu: 0.0.40
codegen_flags: <defaults>
</compile_context>

<pallas_src>
import functools

import jax
import jax.numpy as jnp
from jax import lax
from jax.experimental import pallas as pl
from jax.experimental.pallas import tpu as pltpu


_VMEM_LIMIT = 64 * 1024 * 1024  # explicit scoped-VMEM limit (v5e default is 16 MiB)


# ---------------------------------------------------------------------------
# tiling helper
# ---------------------------------------------------------------------------

def _pick_tile(dim, target, align):
    """Largest multiple of `align` that divides `dim` and is <= target; else full dim."""
    if dim <= target:
        return dim
    t = (target // align) * align
    while t >= align:
        if dim % t == 0:
            return t
        t -= align
    return dim


# ---------------------------------------------------------------------------
# tiled linear (+bias, optional gelu)
# ---------------------------------------------------------------------------

def _linear_kernel(x_ref, w_ref, b_ref, o_ref, acc_ref, *, activation):
    @pl.when(pl.program_id(2) == 0)
    def _():
        acc_ref[...] = jnp.zeros_like(acc_ref)

    acc_ref[...] += jnp.dot(x_ref[...], w_ref[...],
                            preferred_element_type=jnp.float32)

    @pl.when(pl.program_id(2) == pl.num_programs(2) - 1)
    def _():
        y = acc_ref[...] + b_ref[...].astype(jnp.float32)
        if activation == "gelu":
            # exact (erf) gelu, Megatron's non-approx path
            y = 0.5 * y * (1.0 + lax.erf(y * jnp.float32(0.7071067811865475)))
        o_ref[...] = y.astype(o_ref.dtype)


def linear(x, w, b, activation=None, *, out_dtype=None,
           tm_target=512, tn_target=512, tk_target=1024):
    """x: [M, K], w: [K, N], b: [N] -> act(x @ w + b): [M, N].

    VMEM footprint at (512, 512, 1024) tiles is ~6.5 MiB with double-buffering,
    so it fits every generation (incl. v7x's 64 MiB physical); at real BERT
    sizes M//tm and N//tn stay >= 2 so both v7x TensorCores get grid slices.
    """
    M, K = x.shape
    K2, N = w.shape
    assert K == K2
    out_dtype = out_dtype or x.dtype
    tm = _pick_tile(M, tm_target, 8)
    tn = _pick_tile(N, tn_target, 128)
    tk = _pick_tile(K, tk_target, 128)
    b2 = b.reshape(1, N)

    flops = 2 * M * N * K
    transcendentals = M * N if activation == "gelu" else 0
    bytes_accessed = (x.size * x.dtype.itemsize + w.size * w.dtype.itemsize
                      + b2.size * b2.dtype.itemsize
                      + M * N * jnp.dtype(out_dtype).itemsize)

    return pl.pallas_call(
        functools.partial(_linear_kernel, activation=activation),
        out_shape=jax.ShapeDtypeStruct((M, N), out_dtype),
        grid=(M // tm, N // tn, K // tk),
        in_specs=[
            pl.BlockSpec((tm, tk), lambda i, j, k: (i, k)),
            pl.BlockSpec((tk, tn), lambda i, j, k: (k, j)),
            pl.BlockSpec((1, tn), lambda i, j, k: (0, j)),
        ],
        out_specs=pl.BlockSpec((tm, tn), lambda i, j, k: (i, j)),
        scratch_shapes=[pltpu.VMEM((tm, tn), jnp.float32)],
        compiler_params=pltpu.CompilerParams(
            dimension_semantics=("parallel", "parallel", "arbitrary"),
            vmem_limit_bytes=_VMEM_LIMIT),
        cost_estimate=pl.CostEstimate(flops=flops,
                                      transcendentals=transcendentals,
                                      bytes_accessed=bytes_accessed),
    )(x, w, b2)


# ---------------------------------------------------------------------------
# fused: tiled linear (+bias) + residual add + LayerNorm
# ---------------------------------------------------------------------------

def _linear_res_ln_kernel(x_ref, w_ref, b_ref, r_ref, g_ref, beta_ref,
                          o_ref, acc_ref, *, eps):
    k = pl.program_id(1)

    @pl.when(k == 0)
    def _():
        acc_ref[...] = jnp.zeros_like(acc_ref)

    acc_ref[...] += jnp.dot(x_ref[...], w_ref[...],
                            preferred_element_type=jnp.float32)

    @pl.when(k == pl.num_programs(1) - 1)
    def _():
        z = (acc_ref[...] + b_ref[...].astype(jnp.float32)
             + r_ref[...].astype(jnp.float32))
        # one-pass statistics: E[z], E[z^2]
        mu = jnp.mean(z, axis=-1, keepdims=True)
        m2 = jnp.mean(z * z, axis=-1, keepdims=True)
        var = jnp.maximum(m2 - mu * mu, 0.0)
        y = (z - mu) * lax.rsqrt(var + jnp.float32(eps))
        y = y * g_ref[...].astype(jnp.float32) + beta_ref[...].astype(jnp.float32)
        o_ref[...] = y.astype(o_ref.dtype)


def linear_residual_layernorm(x, w, b, residual, gamma, beta, *, eps,
                              out_dtype=None, tm_target=512, tk_target=1024):
    """LayerNorm(x @ w + b + residual) * gamma + beta.  x: [M,K], w: [K,N], residual: [M,N].

    N is kept resident (full-width accumulator) — fine for BERT-base/large hidden
    sizes; for very large TP shards halve tm/tk targets or tile N.
    """
    M, K = x.shape
    K2, N = w.shape
    assert K == K2 and residual.shape == (M, N)
    out_dtype = out_dtype or x.dtype
    tm = _pick_tile(M, tm_target, 8)
    tk = _pick_tile(K, tk_target, 128)
    b2 = b.reshape(1, N)
    g2 = gamma.reshape(1, N)
    be2 = beta.reshape(1, N)

    flops = 2 * M * N * K + 8 * M * N
    bytes_accessed = (x.size * x.dtype.itemsize + w.size * w.dtype.itemsize
                      + residual.size * residual.dtype.itemsize
                      + M * N * jnp.dtype(out_dtype).itemsize)

    return pl.pallas_call(
        functools.partial(_linear_res_ln_kernel, eps=eps),
        out_shape=jax.ShapeDtypeStruct((M, N), out_dtype),
        grid=(M // tm, K // tk),
        in_specs=[
            pl.BlockSpec((tm, tk), lambda i, k: (i, k)),
            pl.BlockSpec((tk, N), lambda i, k: (k, 0)),
            pl.BlockSpec((1, N), lambda i, k: (0, 0)),
            pl.BlockSpec((tm, N), lambda i, k: (i, 0)),   # residual
            pl.BlockSpec((1, N), lambda i, k: (0, 0)),    # gamma
            pl.BlockSpec((1, N), lambda i, k: (0, 0)),    # beta
        ],
        out_specs=pl.BlockSpec((tm, N), lambda i, k: (i, 0)),
        scratch_shapes=[pltpu.VMEM((tm, N), jnp.float32)],
        compiler_params=pltpu.CompilerParams(
            dimension_semantics=("parallel", "arbitrary"),
            vmem_limit_bytes=_VMEM_LIMIT),
        cost_estimate=pl.CostEstimate(flops=flops, transcendentals=M,
                                      bytes_accessed=bytes_accessed),
    )(x, w, b2, residual, g2, be2)


# ---------------------------------------------------------------------------
# flash attention over the fused qkv tensor (columns laid out [K | V | Q])
# ---------------------------------------------------------------------------

def _flash_attn_kernel(len_ref, q_ref, kv_ref, mask_ref, o_ref,
                       m_sc, l_sc, acc_sc, *,
                       num_heads, head_dim, hidden, scale, tkv):
    b = pl.program_id(0)
    kvi = pl.program_id(2)

    @pl.when(kvi == 0)
    def _():
        m_sc[...] = jnp.full_like(m_sc, -jnp.inf)
        l_sc[...] = jnp.zeros_like(l_sc)
        acc_sc[...] = jnp.zeros_like(acc_sc)

    # Skip KV tiles that lie entirely in the padded tail of this batch row.
    @pl.when(kvi * tkv < len_ref[b])
    def _():
        mask = mask_ref[...].astype(jnp.float32)               # (1, tkv) additive
        # fold 1/sqrt(D) into Q once per grid step (stays bf16 for the MXU)
        q = q_ref[...] * scale                                 # (tq, H)

        # load running stats once per grid step
        m_prev = m_sc[...]                                     # (tq, nH) f32
        l_prev = l_sc[...]                                     # (tq, nH) f32

        m_cols, l_cols, acc_cols = [], [], []
        for h in range(num_heads):
            c0, c1 = h * head_dim, (h + 1) * head_dim
            qh = q[:, c0:c1]                                   # (tq,  D) bf16
            kh = kv_ref[:, c0:c1]                              # (tkv, D) bf16
            vh = kv_ref[:, hidden + c0:hidden + c1]            # (tkv, D) bf16

            # QK^T without transposing K: contract last axes directly on the MXU.
            s = lax.dot_general(qh, kh, (((1,), (1,)), ((), ())),
                                preferred_element_type=jnp.float32) + mask

            m_ph = m_prev[:, h:h + 1]
            m_nh = jnp.maximum(m_ph, jnp.max(s, axis=-1, keepdims=True))
            alpha = jnp.exp(m_ph - m_nh)
            p = jnp.exp(s - m_nh)

            l_cols.append(alpha * l_prev[:, h:h + 1]
                          + jnp.sum(p, axis=-1, keepdims=True))
            pv = jnp.dot(p.astype(vh.dtype), vh,
                         preferred_element_type=jnp.float32)
            acc_cols.append(alpha * acc_sc[:, c0:c1] + pv)
            m_cols.append(m_nh)

        # single full-width store per scratch per grid step (no masked RMWs)
        m_sc[...] = jnp.concatenate(m_cols, axis=-1)
        l_sc[...] = jnp.concatenate(l_cols, axis=-1)
        acc_sc[...] = jnp.concatenate(acc_cols, axis=-1)

    @pl.when(kvi == pl.num_programs(2) - 1)
    def _():
        inv_l = pl.reciprocal(l_sc[...], approx=True)          # (tq, nH) on the EUP
        tq = inv_l.shape[0]
        inv_full = jnp.concatenate(
            [jnp.broadcast_to(inv_l[:, h:h + 1], (tq, head_dim))
             for h in range(num_heads)], axis=-1)              # (tq, H)
        # one full-width multiply + one lane-dense unmasked (tq, H) store
        o_ref[...] = (acc_sc[...] * inv_full).astype(o_ref.dtype)


def flash_attention(qkv, mask, lens, *, num_heads, tq_target=128, tkv_target=512):
    """qkv: [B, S, 3H] with columns [K | V | Q] (heads contiguous inside each block);
       mask: [B, 1, S] additive (0 keep, -1e9 pad); lens: [B] int32 valid lengths.
       Returns context [B, S, H]."""
    B, S, H3 = qkv.shape
    H = H3 // 3
    D = H // num_heads
    scale = 1.0 / float(D) ** 0.5
    tq = _pick_tile(S, tq_target, 8)
    tkv = _pick_tile(S, tkv_target, 128)

    flops = 4 * B * num_heads * S * S * D
    transc = B * num_heads * S * S
    bytes_accessed = (qkv.size * qkv.dtype.itemsize
                      + mask.size * mask.dtype.itemsize
                      + B * S * H * qkv.dtype.itemsize)

    grid_spec = pltpu.PrefetchScalarGridSpec(
        num_scalar_prefetch=1,                  # per-batch valid lengths in SMEM
        grid=(B, S // tq, S // tkv),
        in_specs=[
            # Q rows: column block 2 of width H  -> columns [2H, 3H)
            pl.BlockSpec((None, tq, H), lambda b, qi, ki, lens: (b, qi, 2)),
            # K|V rows in ONE DMA stream: column block 0 of width 2H -> [0, 2H)
            pl.BlockSpec((None, tkv, 2 * H), lambda b, qi, ki, lens: (b, ki, 0)),
            # additive padding mask
            pl.BlockSpec((None, 1, tkv), lambda b, qi, ki, lens: (b, 0, ki)),
        ],
        out_specs=pl.BlockSpec((None, tq, H), lambda b, qi, ki, lens: (b, qi, 0)),
        scratch_shapes=[
            pltpu.VMEM((tq, num_heads), jnp.float32),   # running max  m
            pltpu.VMEM((tq, num_heads), jnp.float32),   # running sum  l
            pltpu.VMEM((tq, H), jnp.float32),           # output accumulator
        ],
    )

    return pl.pallas_call(
        functools.partial(_flash_attn_kernel, num_heads=num_heads,
                          head_dim=D, hidden=H, scale=scale, tkv=tkv),
        out_shape=jax.ShapeDtypeStruct((B, S, H), qkv.dtype),
        grid_spec=grid_spec,
        compiler_params=pltpu.CompilerParams(
            dimension_semantics=("parallel", "parallel", "arbitrary"),
            vmem_limit_bytes=_VMEM_LIMIT),
        cost_estimate=pl.CostEstimate(flops=flops, transcendentals=transc,
                                      bytes_accessed=bytes_accessed),
    )(lens, qkv, qkv, mask)


# ---------------------------------------------------------------------------
# BertLayer_tp forward (only reshapes in the wrapper — no XLA splits/transposes)
# ---------------------------------------------------------------------------

def bert_layer_tp_forward(params, hidden_states, attention_mask=None, *,
                          num_heads, layer_norm_eps=1e-12,
                          compute_dtype=jnp.bfloat16):
    B, S, H = hidden_states.shape
    out_dtype = hidden_states.dtype
    cd = compute_dtype

    x2d = hidden_states.reshape(B * S, H).astype(cd)
    if attention_mask is None:
        mask = jnp.zeros((B, 1, S), jnp.float32)
        lens = jnp.full((B,), S, jnp.int32)
    else:
        mask = attention_mask.reshape(B, 1, S).astype(jnp.float32)
        keep = mask[:, 0, :] >= jnp.float32(-0.5)
        pos = jnp.arange(1, S + 1, dtype=jnp.int32)
        # last valid position + 1 (tiles at/after this index are all-padding)
        lens = jnp.max(jnp.where(keep, pos, 0), axis=-1).astype(jnp.int32)

    # --- BertAttention_tp ---
    residual = x2d
    qkv = linear(x2d, params["w_qkv"], params["b_qkv"])                 # [B*S, 3H] ([K|V|Q])
    ctx = flash_attention(qkv.reshape(B, S, 3 * H), mask, lens,
                          num_heads=num_heads)                          # [B, S, H]
    # out-proj + bias + dropout(identity) + residual + LayerNorm, fused
    attn_out = linear_residual_layernorm(
        ctx.reshape(B * S, H), params["w_out"], params["b_out"],
        residual, params["ln1_g"], params["ln1_b"],
        eps=layer_norm_eps, out_dtype=cd)

    # --- BertMLP_tp ---
    residual = attn_out
    h = linear(attn_out, params["w_fc1"], params["b_fc1"],
               activation="gelu")                                       # [B*S, 4H]
    # fc2 + bias + dropout(identity) + residual + LayerNorm, fused
    out = linear_residual_layernorm(
        h, params["w_fc2"], params["b_fc2"],
        residual, params["ln2_g"], params["ln2_b"],
        eps=layer_norm_eps, out_dtype=out_dtype)

    return out.reshape(B, S, H)


def init_params(key, hidden_size, ffn_size):
    keys = jax.random.split(key, 4)
    std = 0.02
    return {
        # fused qkv columns laid out as [K | V | Q], heads contiguous inside each block
        "w_qkv": std * jax.random.normal(keys[0], (hidden_size, 3 * hidden_size), jnp.float32),
        "b_qkv": jnp.zeros((3 * hidden_size,), jnp.float32),
        "w_out": std * jax.random.normal(keys[1], (hidden_size, hidden_size), jnp.float32),
        "b_out": jnp.zeros((hidden_size,), jnp.float32),
        "ln1_g": jnp.ones((hidden_size,), jnp.float32),
        "ln1_b": jnp.zeros((hidden_size,), jnp.float32),
        "w_fc1": std * jax.random.normal(keys[2], (hidden_size, ffn_size), jnp.float32),
        "b_fc1": jnp.zeros((ffn_size,), jnp.float32),
        "w_fc2": std * jax.random.normal(keys[3], (ffn_size, hidden_size), jnp.float32),
        "b_fc2": jnp.zeros((hidden_size,), jnp.float32),
        "ln2_g": jnp.ones((hidden_size,), jnp.float32),
        "ln2_b": jnp.zeros((hidden_size,), jnp.float32),
    }


def prepare_params(params, compute_dtype=jnp.bfloat16):
    """Cast the big weight matrices to the MXU compute dtype ONCE (outside jit).
    Biases / LayerNorm params stay f32 (they are consumed in f32 epilogues)."""
    out = dict(params)
    for k in ("w_qkv", "w_out", "w_fc1", "w_fc2"):
        out[k] = params[k].astype(compute_dtype)
    return out


if __name__ == "__main__":
    # small but lane-aligned shapes: hidden multiple of 128, head_dim = 32
    B, S, H, NH = 2, 8, 128, 4
    FFN = 4 * H

    key = jax.random.PRNGKey(0)
    k_x, k_p = jax.random.split(key)
    hidden_states = jax.random.normal(k_x, (B, S, H), jnp.float32)

    # padding mask: batch 0 has all 8 tokens valid, batch 1 has 6 valid tokens
    valid_len = jnp.array([8, 6])
    pos = jnp.arange(S)[None, :]
    keep = pos < valid_len[:, None]
    attention_mask = jnp.where(keep, 0.0, -1e9).astype(jnp.float32)
    attention_mask = attention_mask[:, None, None, :]      # [B, 1, 1, S]

    params = prepare_params(init_params(k_p, H, FFN))       # bf16 weights, once

    fwd = jax.jit(functools.partial(bert_layer_tp_forward, num_heads=NH))
    out = fwd(params, hidden_states, attention_mask)
    out = jax.block_until_ready(out)
    assert out.shape == (B, S, H)
    assert jnp.all(jnp.isfinite(out))
    print("KERNEL_OK")
</pallas_src>

<mosaic_0001>
module attributes {stable_mosaic.version = 11 : i64} {
  func.func @_linear_kernel(%arg0: i32, %arg1: i32, %arg2: i32, %arg3: memref<16x128xbf16, #tpu.memory_space<vmem>>, %arg4: memref<128x384xbf16, #tpu.memory_space<vmem>>, %arg5: memref<1x384xf32, #tpu.memory_space<vmem>>, %arg6: memref<16x384xbf16, #tpu.memory_space<vmem>>, %arg7: memref<16x384xf32, #tpu.memory_space<vmem>>) attributes {dimension_semantics = [#tpu.dimension_semantics<parallel>, #tpu.dimension_semantics<parallel>, #tpu.dimension_semantics<arbitrary>], iteration_bounds = array<i64: 1, 1, 1>, scalar_prefetch = 0 : i64, scratch_operands = 1 : i64, tpu.core_type = #tpu.core_type<tc>, window_params = [{transform_indices = @transform_0, window_bounds = array<i64: 16, 128>}, {transform_indices = @transform_1, window_bounds = array<i64: 128, 384>}, {transform_indices = @transform_2, window_bounds = array<i64: 1, 384>}, {transform_indices = @transform_3, window_bounds = array<i64: 16, 384>}]} {
    %c0_i32 = arith.constant 0 : i32
    %0 = arith.cmpi eq, %arg2, %c0_i32 : i32
    %1 = arith.extui %0 : i1 to i32
    %c0_i32_0 = arith.constant 0 : i32
    %2 = arith.cmpi ne, %1, %c0_i32_0 : i32
    scf.if %2 {
      %cst_10 = arith.constant 0.000000e+00 : f32
      %12 = vector.broadcast %cst_10 : f32 to vector<16x384xf32>
      %c0_11 = arith.constant 0 : index
      %c0_12 = arith.constant 0 : index
      %13 = vector.load %arg7[%c0_11, %c0_12] : memref<16x384xf32, #tpu.memory_space<vmem>>, vector<16x384xf32>
      tpu.vector_store %arg7[%c0_11, %c0_12], %12 {strides = array<i32>} : memref<16x384xf32, #tpu.memory_space<vmem>>, vector<16x384xf32>,
    } else {
    }
    %c0 = arith.constant 0 : index
    %c0_1 = arith.constant 0 : index
    %3 = vector.load %arg7[%c0, %c0_1] : memref<16x384xf32, #tpu.memory_space<vmem>>, vector<16x384xf32>
    %c0_2 = arith.constant 0 : index
    %c0_3 = arith.constant 0 : index
    %4 = vector.load %arg3[%c0_2, %c0_3] : memref<16x128xbf16, #tpu.memory_space<vmem>>, vector<16x128xbf16>
    %c0_4 = arith.constant 0 : index
    %c0_5 = arith.constant 0 : index
    %5 = vector.load %arg4[%c0_4, %c0_5] : memref<128x384xbf16, #tpu.memory_space<vmem>>, vector<128x384xbf16>
    %cst = arith.constant dense<0.000000e+00> : vector<16x384xf32>
    %6 = tpu.matmul %4, %5, %cst {dimension_numbers = #tpu.dot_dimension_numbers<[1], [0], [0], [1], [0, 0, 1, 1], [], []>} : vector<16x128xbf16>, vector<128x384xbf16>, vector<16x384xf32> -> vector<16x384xf32>
    %7 = arith.addf %3, %6 : vector<16x384xf32>
    %c0_6 = arith.constant 0 : index
    %c0_7 = arith.constant 0 : index
    %8 = vector.load %arg7[%c0_6, %c0_7] : memref<16x384xf32, #tpu.memory_space<vmem>>, vector<16x384xf32>
    tpu.vector_store %arg7[%c0_6, %c0_7], %7 {strides = array<i32>} : memref<16x384xf32, #tpu.memory_space<vmem>>, vector<16x384xf32>,
    %c0_i32_8 = arith.constant 0 : i32
    %9 = arith.cmpi eq, %arg2, %c0_i32_8 : i32
    %10 = arith.extui %9 : i1 to i32
    %c0_i32_9 = arith.constant 0 : i32
    %11 = arith.cmpi ne, %10, %c0_i32_9 : i32
    scf.if %11 {
      %c0_10 = arith.constant 0 : index
      %c0_11 = arith.constant 0 : index
      %12 = vector.load %arg7[%c0_10, %c0_11] : memref<16x384xf32, #tpu.memory_space<vmem>>, vector<16x384xf32>
      %c0_12 = arith.constant 0 : index
      %c0_13 = arith.constant 0 : index
      %13 = vector.load %arg5[%c0_12, %c0_13] : memref<1x384xf32, #tpu.memory_space<vmem>>, vector<1x384xf32>
      %14 = vector.broadcast %13 : vector<1x384xf32> to vector<16x384xf32>
      %15 = arith.addf %12, %14 : vector<16x384xf32>
      %16 = arith.truncf %15 : vector<16x384xf32> to vector<16x384xbf16>
      %c0_14 = arith.constant 0 : index
      %c0_15 = arith.constant 0 : index
      %17 = vector.load %arg6[%c0_14, %c0_15] : memref<16x384xbf16, #tpu.memory_space<vmem>>, vector<16x384xbf16>
      tpu.vector_store %arg6[%c0_14, %c0_15], %16 {strides = array<i32>} : memref<16x384xbf16, #tpu.memory_space<vmem>>, vector<16x384xbf16>,
    } else {
    }
    return
  }
  func.func @transform_0(%arg0: i32, %arg1: i32, %arg2: i32) -> (i32, i32) {
    %c0_i32 = arith.constant 0 : i32
    return %arg0, %arg2 : i32, i32
  }
  func.func @transform_1(%arg0: i32, %arg1: i32, %arg2: i32) -> (i32, i32) {
    %c0_i32 = arith.constant 0 : i32
    return %arg2, %arg1 : i32, i32
  }
  func.func @transform_2(%arg0: i32, %arg1: i32, %arg2: i32) -> (i32, i32) {
    %c0_i32 = arith.constant 0 : i32
    %c0_i32_0 = arith.constant 0 : i32
    return %c0_i32, %arg1 : i32, i32
  }
  func.func @transform_3(%arg0: i32, %arg1: i32, %arg2: i32) -> (i32, i32) {
    %c0_i32 = arith.constant 0 : i32
    return %arg0, %arg1 : i32, i32
  }
}

module attributes {stable_mosaic.version = 11 : i64} {
  func.func @_linear_res_ln_kernel(%arg0: i32, %arg1: i32, %arg2: memref<16x128xbf16, #tpu.memory_space<vmem>>, %arg3: memref<128x128xbf16, #tpu.memory_space<vmem>>, %arg4: memref<1x128xf32, #tpu.memory_space<vmem>>, %arg5: memref<16x128xbf16, #tpu.memory_space<vmem>>, %arg6: memref<1x128xf32, #tpu.memory_space<vmem>>, %arg7: memref<1x128xf32, #tpu.memory_space<vmem>>, %arg8: memref<16x128xbf16, #tpu.memory_space<vmem>>, %arg9: memref<16x128xf32, #tpu.memory_space<vmem>>) attributes {dimension_semantics = [#tpu.dimension_semantics<parallel>, #tpu.dimension_semantics<arbitrary>], iteration_bounds = array<i64: 1, 1>, scalar_prefetch = 0 : i64, scratch_operands = 1 : i64, tpu.core_type = #tpu.core_type<tc>, window_params = [{transform_indices = @transform_0, window_bounds = array<i64: 16, 128>}, {transform_indices = @transform_1, window_bounds = array<i64: 128, 128>}, {pipeline_mode = #tpu.pipeline_mode<synchronous>, transform_indices = @transform_2, window_bounds = array<i64: 1, 128>}, {transform_indices = @transform_3, window_bounds = array<i64: 16, 128>}, {pipeline_mode = #tpu.pipeline_mode<synchronous>, transform_indices = @transform_4, window_bounds = array<i64: 1, 128>}, {pipeline_mode = #tpu.pipeline_mode<synchronous>, transform_indices = @transform_5, window_bounds = array<i64: 1, 128>}, {transform_indices = @transform_6, window_bounds = array<i64: 16, 128>}]} {
    %c0_i32 = arith.constant 0 : i32
    %0 = arith.cmpi eq, %arg1, %c0_i32 : i32
    %1 = arith.extui %0 : i1 to i32
    %c0_i32_0 = arith.constant 0 : i32
    %2 = arith.cmpi ne, %1, %c0_i32_0 : i32
    scf.if %2 {
      %cst_10 = arith.constant 0.000000e+00 : f32
      %12 = vector.broadcast %cst_10 : f32 to vector<16x128xf32>
      %c0_11 = arith.constant 0 : index
      %c0_12 = arith.constant 0 : index
      %13 = vector.load %arg9[%c0_11, %c0_12] : memref<16x128xf32, #tpu.memory_space<vmem>>, vector<16x128xf32>
      tpu.vector_store %arg9[%c0_11, %c0_12], %12 {strides = array<i32>} : memref<16x128xf32, #tpu.memory_space<vmem>>, vector<16x128xf32>,
    } else {
    }
    %c0 = arith.constant 0 : index
    %c0_1 = arith.constant 0 : index
    %3 = vector.load %arg9[%c0, %c0_1] : memref<16x128xf32, #tpu.memory_space<vmem>>, vector<16x128xf32>
    %c0_2 = arith.constant 0 : index
    %c0_3 = arith.constant 0 : index
    %4 = vector.load %arg2[%c0_2, %c0_3] : memref<16x128xbf16, #tpu.memory_space<vmem>>, vector<16x128xbf16>
    %c0_4 = arith.constant 0 : index
    %c0_5 = arith.constant 0 : index
    %5 = vector.load %arg3[%c0_4, %c0_5] : memref<128x128xbf16, #tpu.memory_space<vmem>>, vector<128x128xbf16>
    %cst = arith.constant dense<0.000000e+00> : vector<16x128xf32>
    %6 = tpu.matmul %4, %5, %cst {dimension_numbers = #tpu.dot_dimension_numbers<[1], [0], [0], [1], [0, 0, 1, 1], [], []>} : vector<16x128xbf16>, vector<128x128xbf16>, vector<16x128xf32> -> vector<16x128xf32>
    %7 = arith.addf %3, %6 : vector<16x128xf32>
    %c0_6 = arith.constant 0 : index
    %c0_7 = arith.constant 0 : index
    %8 = vector.load %arg9[%c0_6, %c0_7] : memref<16x128xf32, #tpu.memory_space<vmem>>, vector<16x128xf32>
    tpu.vector_store %arg9[%c0_6, %c0_7], %7 {strides = array<i32>} : memref<16x128xf32, #tpu.memory_space<vmem>>, vector<16x128xf32>,
    %c0_i32_8 = arith.constant 0 : i32
    %9 = arith.cmpi eq, %arg1, %c0_i32_8 : i32
    %10 = arith.extui %9 : i1 to i32
    %c0_i32_9 = arith.constant 0 : i32
    %11 = arith.cmpi ne, %10, %c0_i32_9 : i32
    scf.if %11 {
      %c0_10 = arith.constant 0 : index
      %c0_11 = arith.constant 0 : index
      %12 = vector.load %arg9[%c0_10, %c0_11] : memref<16x128xf32, #tpu.memory_space<vmem>>, vector<16x128xf32>
      %c0_12 = arith.constant 0 : index
      %c0_13 = arith.constant 0 : index
      %13 = vector.load %arg4[%c0_12, %c0_13] : memref<1x128xf32, #tpu.memory_space<vmem>>, vector<1x128xf32>
      %14 = vector.broadcast %13 : vector<1x128xf32> to vector<16x128xf32>
      %15 = arith.addf %12, %14 : vector<16x128xf32>
      %c0_14 = arith.constant 0 : index
      %c0_15 = arith.constant 0 : index
      %16 = vector.load %arg5[%c0_14, %c0_15] : memref<16x128xbf16, #tpu.memory_space<vmem>>, vector<16x128xbf16>
      %17 = arith.extf %16 : vector<16x128xbf16> to vector<16x128xf32>
      %18 = arith.addf %15, %17 : vector<16x128xf32>
      %cst_16 = arith.constant dense<0.000000e+00> : vector<16xf32>
      %19 = vector.multi_reduction <add>, %18, %cst_16 [1] : vector<16x128xf32> to vector<16xf32>
      %20 = vector.shape_cast %19 : vector<16xf32> to vector<16x1xf32>
      %cst_17 = arith.constant 1.280000e+02 : f32
      %21 = vector.broadcast %cst_17 : f32 to vector<16x1xf32>
      %22 = arith.divf %20, %21 : vector<16x1xf32>
      %23 = arith.mulf %18, %18 : vector<16x128xf32>
      %cst_18 = arith.constant dense<0.000000e+00> : vector<16xf32>
      %24 = vector.multi_reduction <add>, %23, %cst_18 [1] : vector<16x128xf32> to vector<16xf32>
      %25 = vector.shape_cast %24 : vector<16xf32> to vector<16x1xf32>
      %cst_19 = arith.constant 1.280000e+02 : f32
      %26 = vector.broadcast %cst_19 : f32 to vector<16x1xf32>
      %27 = arith.divf %25, %26 : vector<16x1xf32>
      %28 = arith.mulf %22, %22 : vector<16x1xf32>
      %29 = arith.subf %27, %28 : vector<16x1xf32>
      %cst_20 = arith.constant 0.000000e+00 : f32
      %30 = vector.broadcast %cst_20 : f32 to vector<16x1xf32>
      %31 = arith.maximumf %29, %30 : vector<16x1xf32>
      %32 = vector.broadcast %22 : vector<16x1xf32> to vector<16x128xf32>
      %33 = arith.subf %18, %32 : vector<16x128xf32>
      %cst_21 = arith.constant 9.99999996E-13 : f32
      %34 = vector.broadcast %cst_21 : f32 to vector<16x1xf32>
      %35 = arith.addf %31, %34 : vector<16x1xf32>
      %36 = math.rsqrt %35 : vector<16x1xf32>
      %37 = vector.broadcast %36 : vector<16x1xf32> to vector<16x128xf32>
      %38 = arith.mulf %33, %37 : vector<16x128xf32>
      %c0_22 = arith.constant 0 : index
      %c0_23 = arith.constant 0 : index
      %39 = vector.load %arg6[%c0_22, %c0_23] : memref<1x128xf32, #tpu.memory_space<vmem>>, vector<1x128xf32>
      %40 = vector.broadcast %39 : vector<1x128xf32> to vector<16x128xf32>
      %41 = arith.mulf %38, %40 : vector<16x128xf32>
      %c0_24 = arith.constant 0 : index
      %c0_25 = arith.constant 0 : index
      %42 = vector.load %arg7[%c0_24, %c0_25] : memref<1x128xf32, #tpu.memory_space<vmem>>, vector<1x128xf32>
      %43 = vector.broadcast %42 : vector<1x128xf32> to vector<16x128xf32>
      %44 = arith.addf %41, %43 : vector<16x128xf32>
      %45 = arith.truncf %44 : vector<16x128xf32> to vector<16x128xbf16>
      %c0_26 = arith.constant 0 : index
      %c0_27 = arith.constant 0 : index
      %46 = vector.load %arg8[%c0_26, %c0_27] : memref<16x128xbf16, #tpu.memory_space<vmem>>, vector<16x128xbf16>
      tpu.vector_store %arg8[%c0_26, %c0_27], %45 {strides = array<i32>} : memref<16x128xbf16, #tpu.memory_space<vmem>>, vector<16x128xbf16>,
    } else {
    }
    return
  }
  func.func @transform_0(%arg0: i32, %arg1: i32) -> (i32, i32) {
    %c0_i32 = arith.constant 0 : i32
    return %arg0, %arg1 : i32, i32
  }
  func.func @transform_1(%arg0: i32, %arg1: i32) -> (i32, i32) {
    %c0_i32 = arith.constant 0 : i32
    %c0_i32_0 = arith.constant 0 : i32
    return %arg1, %c0_i32 : i32, i32
  }
  func.func @transform_2(%arg0: i32, %arg1: i32) -> (i32, i32) {
    %c0_i32 = arith.constant 0 : i32
    %c0_i32_0 = arith.constant 0 : i32
    %c0_i32_1 = arith.constant 0 : i32
    return %c0_i32, %c0_i32_0 : i32, i32
  }
  func.func @transform_3(%arg0: i32, %arg1: i32) -> (i32, i32) {
    %c0_i32 = arith.constant 0 : i32
    %c0_i32_0 = arith.constant 0 : i32
    return %arg0, %c0_i32 : i32, i32
  }
  func.func @transform_4(%arg0: i32, %arg1: i32) -> (i32, i32) {
    %c0_i32 = arith.constant 0 : i32
    %c0_i32_0 = arith.constant 0 : i32
    %c0_i32_1 = arith.constant 0 : i32
    return %c0_i32, %c0_i32_0 : i32, i32
  }
  func.func @transform_5(%arg0: i32, %arg1: i32) -> (i32, i32) {
    %c0_i32 = arith.constant 0 : i32
    %c0_i32_0 = arith.constant 0 : i32
    %c0_i32_1 = arith.constant 0 : i32
    return %c0_i32, %c0_i32_0 : i32, i32
  }
  func.func @transform_6(%arg0: i32, %arg1: i32) -> (i32, i32) {
    %c0_i32 = arith.constant 0 : i32
    %c0_i32_0 = arith.constant 0 : i32
    return %arg0, %c0_i32 : i32, i32
  }
}

module attributes {stable_mosaic.version = 11 : i64} {
  func.func @_flash_attn_kernel(%arg0: i32, %arg1: i32, %arg2: i32, %arg3: memref<2xi32, #tpu.memory_space<smem>>, %arg4: memref<1x8x128xbf16, #tpu.memory_space<vmem>>, %arg5: memref<1x8x256xbf16, #tpu.memory_space<vmem>>, %arg6: memref<1x1x8xf32, #tpu.memory_space<vmem>>, %arg7: memref<1x8x128xbf16, #tpu.memory_space<vmem>>, %arg8: memref<8x4xf32, #tpu.memory_space<vmem>>, %arg9: memref<8x4xf32, #tpu.memory_space<vmem>>, %arg10: memref<8x128xf32, #tpu.memory_space<vmem>>) attributes {dimension_semantics = [#tpu.dimension_semantics<parallel>, #tpu.dimension_semantics<parallel>, #tpu.dimension_semantics<arbitrary>], iteration_bounds = array<i64: 2, 1, 1>, scalar_prefetch = 1 : i64, scratch_operands = 3 : i64, tpu.core_type = #tpu.core_type<tc>, window_params = [{transform_indices = @transform_0, window_bounds = array<i64: 1, 8, 128>}, {transform_indices = @transform_1, window_bounds = array<i64: 1, 8, 256>}, {transform_indices = @transform_2, window_bounds = array<i64: 1, 1, 8>}, {transform_indices = @transform_3, window_bounds = array<i64: 1, 8, 128>}]} {
    %c0_i32 = arith.constant 0 : i32
    %0 = arith.cmpi eq, %arg2, %c0_i32 : i32
    %1 = arith.extui %0 : i1 to i32
    %c0_i32_0 = arith.constant 0 : i32
    %2 = arith.cmpi ne, %1, %c0_i32_0 : i32
    scf.if %2 {
      %cst = arith.constant 0xFF800000 : f32
      %12 = vector.broadcast %cst : f32 to vector<8x4xf32>
      %c0 = arith.constant 0 : index
      %c0_4 = arith.constant 0 : index
      %13 = vector.load %arg8[%c0, %c0_4] : memref<8x4xf32, #tpu.memory_space<vmem>>, vector<8x4xf32>
      tpu.vector_store %arg8[%c0, %c0_4], %12 {strides = array<i32>} : memref<8x4xf32, #tpu.memory_space<vmem>>, vector<8x4xf32>,
      %cst_5 = arith.constant 0.000000e+00 : f32
      %14 = vector.broadcast %cst_5 : f32 to vector<8x4xf32>
      %c0_6 = arith.constant 0 : index
      %c0_7 = arith.constant 0 : index
      %15 = vector.load %arg9[%c0_6, %c0_7] : memref<8x4xf32, #tpu.memory_space<vmem>>, vector<8x4xf32>
      tpu.vector_store %arg9[%c0_6, %c0_7], %14 {strides = array<i32>} : memref<8x4xf32, #tpu.memory_space<vmem>>, vector<8x4xf32>,
      %cst_8 = arith.constant 0.000000e+00 : f32
      %16 = vector.broadcast %cst_8 : f32 to vector<8x128xf32>
      %c0_9 = arith.constant 0 : index
      %c0_10 = arith.constant 0 : index
      %17 = vector.load %arg10[%c0_9, %c0_10] : memref<8x128xf32, #tpu.memory_space<vmem>>, vector<8x128xf32>
      tpu.vector_store %arg10[%c0_9, %c0_10], %16 {strides = array<i32>} : memref<8x128xf32, #tpu.memory_space<vmem>>, vector<8x128xf32>,
    } else {
    }
    %c8_i32 = arith.constant 8 : i32
    %3 = arith.muli %arg2, %c8_i32 : i32
    %4 = arith.index_cast %arg0 : i32 to index
    %5 = memref.load %arg3[%4] : memref<2xi32, #tpu.memory_space<smem>>
    %6 = arith.cmpi slt, %3, %5 : i32
    %7 = arith.extui %6 : i1 to i32
    %c0_i32_1 = arith.constant 0 : i32
    %8 = arith.cmpi ne, %7, %c0_i32_1 : i32
    scf.if %8 {
      %c0 = arith.constant 0 : index
      %c0_4 = arith.constant 0 : index
      %c0_5 = arith.constant 0 : index
      %12 = vector.load %arg6[%c0, %c0_4, %c0_5] : memref<1x1x8xf32, #tpu.memory_space<vmem>>, vector<1x1x8xf32>
      %13 = vector.shape_cast %12 : vector<1x1x8xf32> to vector<1x8xf32>
      %c0_6 = arith.constant 0 : index
      %c0_7 = arith.constant 0 : index
      %c0_8 = arith.constant 0 : index
      %14 = vector.load %arg4[%c0_6, %c0_7, %c0_8] : memref<1x8x128xbf16, #tpu.memory_space<vmem>>, vector<1x8x128xbf16>
      %15 = vector.shape_cast %14 : vector<1x8x128xbf16> to vector<8x128xbf16>
      %cst = arith.constant 1.767580e-01 : bf16
      %16 = vector.broadcast %cst : bf16 to vector<8x128xbf16>
      %17 = arith.mulf %15, %16 : vector<8x128xbf16>
      %c0_9 = arith.constant 0 : index
      %c0_10 = arith.constant 0 : index
      %18 = vector.load %arg8[%c0_9, %c0_10] : memref<8x4xf32, #tpu.memory_space<vmem>>, vector<8x4xf32>
      %c0_11 = arith.constant 0 : index
      %c0_12 = arith.constant 0 : index
      %19 = vector.load %arg9[%c0_11, %c0_12] : memref<8x4xf32, #tpu.memory_space<vmem>>, vector<8x4xf32>
      %20 = vector.extract_strided_slice %17 {offsets = [0, 0], sizes = [8, 32], strides = [1, 1]} : vector<8x128xbf16> to vector<8x32xbf16>
      %c0_13 = arith.constant 0 : index
      %c0_14 = arith.constant 0 : index
      %c0_15 = arith.constant 0 : index
      %21 = vector.load %arg5[%c0_13, %c0_14, %c0_15] : memref<1x8x256xbf16, #tpu.memory_space<vmem>>, vector<1x8x32xbf16>
      %22 = vector.shape_cast %21 : vector<1x8x32xbf16> to vector<8x32xbf16>
      %c0_16 = arith.constant 0 : index
      %c0_17 = arith.constant 0 : index
      %c128 = arith.constant 128 : index
      %23 = vector.load %arg5[%c0_16, %c0_17, %c128] : memref<1x8x256xbf16, #tpu.memory_space<vmem>>, vector<1x8x32xbf16>
      %24 = vector.shape_cast %23 : vector<1x8x32xbf16> to vector<8x32xbf16>
      %cst_18 = arith.constant dense<0.000000e+00> : vector<8x8xf32>
      %25 = tpu.matmul %20, %22, %cst_18 {dimension_numbers = #tpu.dot_dimension_numbers<[1], [1], [0], [0], [0, 0, 1, 0], [], []>} : vector<8x32xbf16>, vector<8x32xbf16>, vector<8x8xf32> -> vector<8x8xf32>
      %26 = vector.broadcast %13 : vector<1x8xf32> to vector<8x8xf32>
      %27 = arith.addf %25, %26 : vector<8x8xf32>
      %28 = vector.extract_strided_slice %18 {offsets = [0, 0], sizes = [8, 1], strides = [1, 1]} : vector<8x4xf32> to vector<8x1xf32>
      %cst_19 = arith.constant dense<0xFF800000> : vector<8xf32>
      %29 = vector.multi_reduction <maximumf>, %27, %cst_19 [1] : vector<8x8xf32> to vector<8xf32>
      %30 = vector.shape_cast %29 : vector<8xf32> to vector<8x1xf32>
      %31 = arith.maximumf %28, %30 : vector<8x1xf32>
      %32 = arith.subf %28, %31 : vector<8x1xf32>
      %33 = math.exp %32 : vector<8x1xf32>
      %34 = vector.broadcast %31 : vector<8x1xf32> to vector<8x8xf32>
      %35 = arith.subf %27, %34 : vector<8x8xf32>
      %36 = math.exp %35 : vector<8x8xf32>
      %37 = vector.extract_strided_slice %19 {offsets = [0, 0], sizes = [8, 1], strides = [1, 1]} : vector<8x4xf32> to vector<8x1xf32>
      %38 = arith.mulf %33, %37 : vector<8x1xf32>
      %cst_20 = arith.constant dense<0.000000e+00> : vector<8xf32>
      %39 = vector.multi_reduction <add>, %36, %cst_20 [1] : vector<8x8xf32> to vector<8xf32>
      %40 = vector.shape_cast %39 : vector<8xf32> to vector<8x1xf32>
      %41 = arith.addf %38, %40 : vector<8x1xf32>
      %42 = arith.truncf %36 : vector<8x8xf32> to vector<8x8xbf16>
      %cst_21 = arith.constant dense<0.000000e+00> : vector<8x32xf32>
      %43 = tpu.matmul %42, %24, %cst_21 {dimension_numbers = #tpu.dot_dimension_numbers<[1], [0], [0], [1], [0, 0, 1, 1], [], []>} : vector<8x8xbf16>, vector<8x32xbf16>, vector<8x32xf32> -> vector<8x32xf32>
      %c0_22 = arith.constant 0 : index
      %c0_23 = arith.constant 0 : index
      %44 = vector.load %arg10[%c0_22, %c0_23] : memref<8x128xf32, #tpu.memory_space<vmem>>, vector<8x32xf32>
      %45 = vector.broadcast %33 : vector<8x1xf32> to vector<8x32xf32>
      %46 = arith.mulf %45, %44 : vector<8x32xf32>
      %47 = arith.addf %46, %43 : vector<8x32xf32>
      %48 = vector.extract_strided_slice %17 {offsets = [0, 32], sizes = [8, 32], strides = [1, 1]} : vector<8x128xbf16> to vector<8x32xbf16>
      %c0_24 = arith.constant 0 : index
      %c0_25 = arith.constant 0 : index
      %c32 = arith.constant 32 : index
      %49 = vector.load %arg5[%c0_24, %c0_25, %c32] : memref<1x8x256xbf16, #tpu.memory_space<vmem>>, vector<1x8x32xbf16>
      %50 = vector.shape_cast %49 : vector<1x8x32xbf16> to vector<8x32xbf16>
      %c0_26 = arith.constant 0 : index
      %c0_27 = arith.constant 0 : index
      %c160 = arith.constant 160 : index
      %51 = vector.load %arg5[%c0_26, %c0_27, %c160] : memref<1x8x256xbf16, #tpu.memory_space<vmem>>, vector<1x8x32xbf16>
      %52 = vector.shape_cast %51 : vector<1x8x32xbf16> to vector<8x32xbf16>
      %cst_28 = arith.constant dense<0.000000e+00> : vector<8x8xf32>
      %53 = tpu.matmul %48, %50, %cst_28 {dimension_numbers = #tpu.dot_dimension_numbers<[1], [1], [0], [0], [0, 0, 1, 0], [], []>} : vector<8x32xbf16>, vector<8x32xbf16>, vector<8x8xf32> -> vector<8x8xf32>
      %54 = vector.broadcast %13 : vector<1x8xf32> to vector<8x8xf32>
      %55 = arith.addf %53, %54 : vector<8x8xf32>
      %56 = vector.extract_strided_slice %18 {offsets = [0, 1], sizes = [8, 1], strides = [1, 1]} : vector<8x4xf32> to vector<8x1xf32>
      %cst_29 = arith.constant dense<0xFF800000> : vector<8xf32>
      %57 = vector.multi_reduction <maximumf>, %55, %cst_29 [1] : vector<8x8xf32> to vector<8xf32>
      %58 = vector.shape_cast %57 : vector<8xf32> to vector<8x1xf32>
      %59 = arith.maximumf %56, %58 : vector<8x1xf32>
      %60 = arith.subf %56, %59 : vector<8x1xf32>
      %61 = math.exp %60 : vector<8x1xf32>
      %62 = vector.broadcast %59 : vector<8x1xf32> to vector<8x8xf32>
      %63 = arith.subf %55, %62 : vector<8x8xf32>
      %64 = math.exp %63 : vector<8x8xf32>
      %65 = vector.extract_strided_slice %19 {offsets = [0, 1], sizes = [8, 1], strides = [1, 1]} : vector<8x4xf32> to vector<8x1xf32>
      %66 = arith.mulf %61, %65 : vector<8x1xf32>
      %cst_30 = arith.constant dense<0.000000e+00> : vector<8xf32>
      %67 = vector.multi_reduction <add>, %64, %cst_30 [1] : vector<8x8xf32> to vector<8xf32>
      %68 = vector.shape_cast %67 : vector<8xf32> to vector<8x1xf32>
      %69 = arith.addf %66, %68 : vector<8x1xf32>
      %70 = arith.truncf %64 : vector<8x8xf32> to vector<8x8xbf16>
      %cst_31 = arith.constant dense<0.000000e+00> : vector<8x32xf32>
      %71 = tpu.matmul %70, %52, %cst_31 {dimension_numbers = #tpu.dot_dimension_numbers<[1], [0], [0], [1], [0, 0, 1, 1], [], []>} : vector<8x8xbf16>, vector<8x32xbf16>, vector<8x32xf32> -> vector<8x32xf32>
      %c0_32 = arith.constant 0 : index
      %c32_33 = arith.constant 32 : index
      %72 = vector.load %arg10[%c0_32, %c32_33] : memref<8x128xf32, #tpu.memory_space<vmem>>, vector<8x32xf32>
      %73 = vector.broadcast %61 : vector<8x1xf32> to vector<8x32xf32>
      %74 = arith.mulf %73, %72 : vector<8x32xf32>
      %75 = arith.addf %74, %71 : vector<8x32xf32>
      %76 = vector.extract_strided_slice %17 {offsets = [0, 64], sizes = [8, 32], strides = [1, 1]} : vector<8x128xbf16> to vector<8x32xbf16>
      %c0_34 = arith.constant 0 : index
      %c0_35 = arith.constant 0 : index
      %c64 = arith.constant 64 : index
      %77 = vector.load %arg5[%c0_34, %c0_35, %c64] : memref<1x8x256xbf16, #tpu.memory_space<vmem>>, vector<1x8x32xbf16>
      %78 = vector.shape_cast %77 : vector<1x8x32xbf16> to vector<8x32xbf16>
      %c0_36 = arith.constant 0 : index
      %c0_37 = arith.constant 0 : index
      %c192 = arith.constant 192 : index
      %79 = vector.load %arg5[%c0_36, %c0_37, %c192] : memref<1x8x256xbf16, #tpu.memory_space<vmem>>, vector<1x8x32xbf16>
      %80 = vector.shape_cast %79 : vector<1x8x32xbf16> to vector<8x32xbf16>
      %cst_38 = arith.constant dense<0.000000e+00> : vector<8x8xf32>
      %81 = tpu.matmul %76, %78, %cst_38 {dimension_numbers = #tpu.dot_dimension_numbers<[1], [1], [0], [0], [0, 0, 1, 0], [], []>} : vector<8x32xbf16>, vector<8x32xbf16>, vector<8x8xf32> -> vector<8x8xf32>
      %82 = vector.broadcast %13 : vector<1x8xf32> to vector<8x8xf32>
      %83 = arith.addf %81, %82 : vector<8x8xf32>
      %84 = vector.extract_strided_slice %18 {offsets = [0, 2], sizes = [8, 1], strides = [1, 1]} : vector<8x4xf32> to vector<8x1xf32>
      %cst_39 = arith.constant dense<0xFF800000> : vector<8xf32>
      %85 = vector.multi_reduction <maximumf>, %83, %cst_39 [1] : vector<8x8xf32> to vector<8xf32>
      %86 = vector.shape_cast %85 : vector<8xf32> to vector<8x1xf32>
      %87 = arith.maximumf %84, %86 : vector<8x1xf32>
      %88 = arith.subf %84, %87 : vector<8x1xf32>
      %89 = math.exp %88 : vector<8x1xf32>
      %90 = vector.broadcast %87 : vector<8x1xf32> to vector<8x8xf32>
      %91 = arith.subf %83, %90 : vector<8x8xf32>
      %92 = math.exp %91 : vector<8x8xf32>
      %93 = vector.extract_strided_slice %19 {offsets = [0, 2], sizes = [8, 1], strides = [1, 1]} : vector<8x4xf32> to vector<8x1xf32>
      %94 = arith.mulf %89, %93 : vector<8x1xf32>
      %cst_40 = arith.constant dense<0.000000e+00> : vector<8xf32>
      %95 = vector.multi_reduction <add>, %92, %cst_40 [1] : vector<8x8xf32> to vector<8xf32>
      %96 = vector.shape_cast %95 : vector<8xf32> to vector<8x1xf32>
      %97 = arith.addf %94, %96 : vector<8x1xf32>
      %98 = arith.truncf %92 : vector<8x8xf32> to vector<8x8xbf16>
      %cst_41 = arith.constant dense<0.000000e+00> : vector<8x32xf32>
      %99 = tpu.matmul %98, %80, %cst_41 {dimension_numbers = #tpu.dot_dimension_numbers<[1], [0], [0], [1], [0, 0, 1, 1], [], []>} : vector<8x8xbf16>, vector<8x32xbf16>, vector<8x32xf32> -> vector<8x32xf32>
      %c0_42 = arith.constant 0 : index
      %c64_43 = arith.constant 64 : index
      %100 = vector.load %arg10[%c0_42, %c64_43] : memref<8x128xf32, #tpu.memory_space<vmem>>, vector<8x32xf32>
      %101 = vector.broadcast %89 : vector<8x1xf32> to vector<8x32xf32>
      %102 = arith.mulf %101, %100 : vector<8x32xf32>
      %103 = arith.addf %102, %99 : vector<8x32xf32>
      %104 = vector.extract_strided_slice %17 {offsets = [0, 96], sizes = [8, 32], strides = [1, 1]} : vector<8x128xbf16> to vector<8x32xbf16>
      %c0_44 = arith.constant 0 : index
      %c0_45 = arith.constant 0 : index
      %c96 = arith.constant 96 : index
      %105 = vector.load %arg5[%c0_44, %c0_45, %c96] : memref<1x8x256xbf16, #tpu.memory_space<vmem>>, vector<1x8x32xbf16>
      %106 = vector.shape_cast %105 : vector<1x8x32xbf16> to vector<8x32xbf16>
      %c0_46 = arith.constant 0 : index
      %c0_47 = arith.constant 0 : index
      %c224 = arith.constant 224 : index
      %107 = vector.load %arg5[%c0_46, %c0_47, %c224] : memref<1x8x256xbf16, #tpu.memory_space<vmem>>, vector<1x8x32xbf16>
      %108 = vector.shape_cast %107 : vector<1x8x32xbf16> to vector<8x32xbf16>
      %cst_48 = arith.constant dense<0.000000e+00> : vector<8x8xf32>
      %109 = tpu.matmul %104, %106, %cst_48 {dimension_numbers = #tpu.dot_dimension_numbers<[1], [1], [0], [0], [0, 0, 1, 0], [], []>} : vector<8x32xbf16>, vector<8x32xbf16>, vector<8x8xf32> -> vector<8x8xf32>
      %110 = vector.broadcast %13 : vector<1x8xf32> to vector<8x8xf32>
      %111 = arith.addf %109, %110 : vector<8x8xf32>
      %112 = vector.extract_strided_slice %18 {offsets = [0, 3], sizes = [8, 1], strides = [1, 1]} : vector<8x4xf32> to vector<8x1xf32>
      %cst_49 = arith.constant dense<0xFF800000> : vector<8xf32>
      %113 = vector.multi_reduction <maximumf>, %111, %cst_49 [1] : vector<8x8xf32> to vector<8xf32>
      %114 = vector.shape_cast %113 : vector<8xf32> to vector<8x1xf32>
      %115 = arith.maximumf %112, %114 : vector<8x1xf32>
      %116 = arith.subf %112, %115 : vector<8x1xf32>
      %117 = math.exp %116 : vector<8x1xf32>
      %118 = vector.broadcast %115 : vector<8x1xf32> to vector<8x8xf32>
      %119 = arith.subf %111, %118 : vector<8x8xf32>
      %120 = math.exp %119 : vector<8x8xf32>
      %121 = vector.extract_strided_slice %19 {offsets = [0, 3], sizes = [8, 1], strides = [1, 1]} : vector<8x4xf32> to vector<8x1xf32>
      %122 = arith.mulf %117, %121 : vector<8x1xf32>
      %cst_50 = arith.constant dense<0.000000e+00> : vector<8xf32>
      %123 = vector.multi_reduction <add>, %120, %cst_50 [1] : vector<8x8xf32> to vector<8xf32>
      %124 = vector.shape_cast %123 : vector<8xf32> to vector<8x1xf32>
      %125 = arith.addf %122, %124 : vector<8x1xf32>
      %126 = arith.truncf %120 : vector<8x8xf32> to vector<8x8xbf16>
      %cst_51 = arith.constant dense<0.000000e+00> : vector<8x32xf32>
      %127 = tpu.matmul %126, %108, %cst_51 {dimension_numbers = #tpu.dot_dimension_numbers<[1], [0], [0], [1], [0, 0, 1, 1], [], []>} : vector<8x8xbf16>, vector<8x32xbf16>, vector<8x32xf32> -> vector<8x32xf32>
      %c0_52 = arith.constant 0 : index
      %c96_53 = arith.constant 96 : index
      %128 = vector.load %arg10[%c0_52, %c96_53] : memref<8x128xf32, #tpu.memory_space<vmem>>, vector<8x32xf32>
      %129 = vector.broadcast %117 : vector<8x1xf32> to vector<8x32xf32>
      %130 = arith.mulf %129, %128 : vector<8x32xf32>
      %131 = arith.addf %130, %127 : vector<8x32xf32>
      %132 = tpu.concatenate %31, %59, %87, %115 in 1 : vector<8x1xf32>, vector<8x1xf32>, vector<8x1xf32>, vector<8x1xf32> -> vector<8x4xf32>
      %c0_54 = arith.constant 0 : index
      %c0_55 = arith.constant 0 : index
      %133 = vector.load %arg8[%c0_54, %c0_55] : memref<8x4xf32, #tpu.memory_space<vmem>>, vector<8x4xf32>
      tpu.vector_store %arg8[%c0_54, %c0_55], %132 {strides = array<i32>} : memref<8x4xf32, #tpu.memory_space<vmem>>, vector<8x4xf32>,
      %134 = tpu.concatenate %41, %69, %97, %125 in 1 : vector<8x1xf32>, vector<8x1xf32>, vector<8x1xf32>, vector<8x1xf32> -> vector<8x4xf32>
      %c0_56 = arith.constant 0 : index
      %c0_57 = arith.constant 0 : index
      %135 = vector.load %arg9[%c0_56, %c0_57] : memref<8x4xf32, #tpu.memory_space<vmem>>, vector<8x4xf32>
      tpu.vector_store %arg9[%c0_56, %c0_57], %134 {strides = array<i32>} : memref<8x4xf32, #tpu.memory_space<vmem>>, vector<8x4xf32>,
      %136 = tpu.concatenate %47, %75, %103, %131 in 1 : vector<8x32xf32>, vector<8x32xf32>, vector<8x32xf32>, vector<8x32xf32> -> vector<8x128xf32>
      %c0_58 = arith.constant 0 : index
      %c0_59 = arith.constant 0 : index
      %137 = vector.load %arg10[%c0_58, %c0_59] : memref<8x128xf32, #tpu.memory_space<vmem>>, vector<8x128xf32>
      tpu.vector_store %arg10[%c0_58, %c0_59], %136 {strides = array<i32>} : memref<8x128xf32, #tpu.memory_space<vmem>>, vector<8x128xf32>,
    } else {
    }
    %c0_i32_2 = arith.constant 0 : i32
    %9 = arith.cmpi eq, %arg2, %c0_i32_2 : i32
    %10 = arith.extui %9 : i1 to i32
    %c0_i32_3 = arith.constant 0 : i32
    %11 = arith.cmpi ne, %10, %c0_i32_3 : i32
    scf.if %11 {
      %c0 = arith.constant 0 : index
      %c0_4 = arith.constant 0 : index
      %12 = vector.load %arg9[%c0, %c0_4] : memref<8x4xf32, #tpu.memory_space<vmem>>, vector<8x4xf32>
      %13 = tpu.reciprocal %12 {approx = true} : vector<8x4xf32> -> vector<8x4xf32>
      %14 = vector.extract_strided_slice %13 {offsets = [0, 0], sizes = [8, 1], strides = [1, 1]} : vector<8x4xf32> to vector<8x1xf32>
      %15 = vector.shape_cast %14 : vector<8x1xf32> to vector<8x1xf32>
      %16 = vector.broadcast %15 : vector<8x1xf32> to vector<8x32xf32>
      %17 = vector.extract_strided_slice %13 {offsets = [0, 1], sizes = [8, 1], strides = [1, 1]} : vector<8x4xf32> to vector<8x1xf32>
      %18 = vector.shape_cast %17 : vector<8x1xf32> to vector<8x1xf32>
      %19 = vector.broadcast %18 : vector<8x1xf32> to vector<8x32xf32>
      %20 = vector.extract_strided_slice %13 {offsets = [0, 2], sizes = [8, 1], strides = [1, 1]} : vector<8x4xf32> to vector<8x1xf32>
      %21 = vector.shape_cast %20 : vector<8x1xf32> to vector<8x1xf32>
      %22 = vector.broadcast %21 : vector<8x1xf32> to vector<8x32xf32>
      %23 = vector.extract_strided_slice %13 {offsets = [0, 3], sizes = [8, 1], strides = [1, 1]} : vector<8x4xf32> to vector<8x1xf32>
      %24 = vector.shape_cast %23 : vector<8x1xf32> to vector<8x1xf32>
      %25 = vector.broadcast %24 : vector<8x1xf32> to vector<8x32xf32>
      %26 = tpu.concatenate %16, %19, %22, %25 in 1 : vector<8x32xf32>, vector<8x32xf32>, vector<8x32xf32>, vector<8x32xf32> -> vector<8x128xf32>
      %c0_5 = arith.constant 0 : index
      %c0_6 = arith.constant 0 : index
      %27 = vector.load %arg10[%c0_5, %c0_6] : memref<8x128xf32, #tpu.memory_space<vmem>>, vector<8x128xf32>
      %28 = arith.mulf %27, %26 : vector<8x128xf32>
      %29 = arith.truncf %28 : vector<8x128xf32> to vector<8x128xbf16>
      %c0_7 = arith.constant 0 : index
      %c0_8 = arith.constant 0 : index
      %c0_9 = arith.constant 0 : index
      %30 = vector.load %arg7[%c0_7, %c0_8, %c0_9] : memref<1x8x128xbf16, #tpu.memory_space<vmem>>, vector<1x8x128xbf16>
      %31 = vector.shape_cast %30 : vector<1x8x128xbf16> to vector<8x128xbf16>
      %32 = vector.shape_cast %29 : vector<8x128xbf16> to vector<1x8x128xbf16>
      tpu.vector_store %arg7[%c0_7, %c0_8, %c0_9], %32 {strides = array<i32>} : memref<1x8x128xbf16, #tpu.memory_space<vmem>>, vector<1x8x128xbf16>,
    } else {
    }
    return
  }
  func.func @transform_0(%arg0: i32, %arg1: i32, %arg2: i32, %arg3: memref<2xi32, #tpu.memory_space<smem>>) -> (i32, i32, i32) {
    %c2_i32 = arith.constant 2 : i32
    %c0_i32 = arith.constant 0 : i32
    return %arg0, %arg1, %c2_i32 : i32, i32, i32
  }
  func.func @transform_1(%arg0: i32, %arg1: i32, %arg2: i32, %arg3: memref<2xi32, #tpu.memory_space<smem>>) -> (i32, i32, i32) {
    %c0_i32 = arith.constant 0 : i32
    %c0_i32_0 = arith.constant 0 : i32
    return %arg0, %arg2, %c0_i32 : i32, i32, i32
  }
  func.func @transform_2(%arg0: i32, %arg1: i32, %arg2: i32, %arg3: memref<2xi32, #tpu.memory_space<smem>>) -> (i32, i32, i32) {
    %c0_i32 = arith.constant 0 : i32
    %c0_i32_0 = arith.constant 0 : i32
    return %arg0, %c0_i32, %arg2 : i32, i32, i32
  }
  func.func @transform_3(%arg0: i32, %arg1: i32, %arg2: i32, %arg3: memref<2xi32, #tpu.memory_space<smem>>) -> (i32, i32, i32) {
    %c0_i32 = arith.constant 0 : i32
    %c0_i32_0 = arith.constant 0 : i32
    return %arg0, %arg1, %c0_i32 : i32, i32, i32
  }
}

module attributes {stable_mosaic.version = 11 : i64} {
  func.func @_linear_kernel(%arg0: i32, %arg1: i32, %arg2: i32, %arg3: memref<16x128xbf16, #tpu.memory_space<vmem>>, %arg4: memref<128x512xbf16, #tpu.memory_space<vmem>>, %arg5: memref<1x512xf32, #tpu.memory_space<vmem>>, %arg6: memref<16x512xbf16, #tpu.memory_space<vmem>>, %arg7: memref<16x512xf32, #tpu.memory_space<vmem>>) attributes {dimension_semantics = [#tpu.dimension_semantics<parallel>, #tpu.dimension_semantics<parallel>, #tpu.dimension_semantics<arbitrary>], iteration_bounds = array<i64: 1, 1, 1>, scalar_prefetch = 0 : i64, scratch_operands = 1 : i64, tpu.core_type = #tpu.core_type<tc>, window_params = [{transform_indices = @transform_0, window_bounds = array<i64: 16, 128>}, {transform_indices = @transform_1, window_bounds = array<i64: 128, 512>}, {transform_indices = @transform_2, window_bounds = array<i64: 1, 512>}, {transform_indices = @transform_3, window_bounds = array<i64: 16, 512>}]} {
    %c0_i32 = arith.constant 0 : i32
    %0 = arith.cmpi eq, %arg2, %c0_i32 : i32
    %1 = arith.extui %0 : i1 to i32
    %c0_i32_0 = arith.constant 0 : i32
    %2 = arith.cmpi ne, %1, %c0_i32_0 : i32
    scf.if %2 {
      %cst_10 = arith.constant 0.000000e+00 : f32
      %12 = vector.broadcast %cst_10 : f32 to vector<16x512xf32>
      %c0_11 = arith.constant 0 : index
      %c0_12 = arith.constant 0 : index
      %13 = vector.load %arg7[%c0_11, %c0_12] : memref<16x512xf32, #tpu.memory_space<vmem>>, vector<16x512xf32>
      tpu.vector_store %arg7[%c0_11, %c0_12], %12 {strides = array<i32>} : memref<16x512xf32, #tpu.memory_space<vmem>>, vector<16x512xf32>,
    } else {
    }
    %c0 = arith.constant 0 : index
    %c0_1 = arith.constant 0 : index
    %3 = vector.load %arg7[%c0, %c0_1] : memref<16x512xf32, #tpu.memory_space<vmem>>, vector<16x512xf32>
    %c0_2 = arith.constant 0 : index
    %c0_3 = arith.constant 0 : index
    %4 = vector.load %arg3[%c0_2, %c0_3] : memref<16x128xbf16, #tpu.memory_space<vmem>>, vector<16x128xbf16>
    %c0_4 = arith.constant 0 : index
    %c0_5 = arith.constant 0 : index
    %5 = vector.load %arg4[%c0_4, %c0_5] : memref<128x512xbf16, #tpu.memory_space<vmem>>, vector<128x512xbf16>
    %cst = arith.constant dense<0.000000e+00> : vector<16x512xf32>
    %6 = tpu.matmul %4, %5, %cst {dimension_numbers = #tpu.dot_dimension_numbers<[1], [0], [0], [1], [0, 0, 1, 1], [], []>} : vector<16x128xbf16>, vector<128x512xbf16>, vector<16x512xf32> -> vector<16x512xf32>
    %7 = arith.addf %3, %6 : vector<16x512xf32>
    %c0_6 = arith.constant 0 : index
    %c0_7 = arith.constant 0 : index
    %8 = vector.load %arg7[%c0_6, %c0_7] : memref<16x512xf32, #tpu.memory_space<vmem>>, vector<16x512xf32>
    tpu.vector_store %arg7[%c0_6, %c0_7], %7 {strides = array<i32>} : memref<16x512xf32, #tpu.memory_space<vmem>>, vector<16x512xf32>,
    %c0_i32_8 = arith.constant 0 : i32
    %9 = arith.cmpi eq, %arg2, %c0_i32_8 : i32
    %10 = arith.extui %9 : i1 to i32
    %c0_i32_9 = arith.constant 0 : i32
    %11 = arith.cmpi ne, %10, %c0_i32_9 : i32
    scf.if %11 {
      %c0_10 = arith.constant 0 : index
      %c0_11 = arith.constant 0 : index
      %12 = vector.load %arg7[%c0_10, %c0_11] : memref<16x512xf32, #tpu.memory_space<vmem>>, vector<16x512xf32>
      %c0_12 = arith.constant 0 : index
      %c0_13 = arith.constant 0 : index
      %13 = vector.load %arg5[%c0_12, %c0_13] : memref<1x512xf32, #tpu.memory_space<vmem>>, vector<1x512xf32>
      %14 = vector.broadcast %13 : vector<1x512xf32> to vector<16x512xf32>
      %15 = arith.addf %12, %14 : vector<16x512xf32>
      %cst_14 = arith.constant 5.000000e-01 : f32
      %16 = vector.broadcast %cst_14 : f32 to vector<16x512xf32>
      %17 = arith.mulf %16, %15 : vector<16x512xf32>
      %cst_15 = arith.constant 0.707106769 : f32
      %18 = vector.broadcast %cst_15 : f32 to vector<16x512xf32>
      %19 = arith.mulf %15, %18 : vector<16x512xf32>
      %20 = math.erf %19 : vector<16x512xf32>
      %cst_16 = arith.constant 1.000000e+00 : f32
      %21 = vector.broadcast %cst_16 : f32 to vector<16x512xf32>
      %22 = arith.addf %21, %20 : vector<16x512xf32>
      %23 = arith.mulf %17, %22 : vector<16x512xf32>
      %24 = arith.truncf %23 : vector<16x512xf32> to vector<16x512xbf16>
      %c0_17 = arith.constant 0 : index
      %c0_18 = arith.constant 0 : index
      %25 = vector.load %arg6[%c0_17, %c0_18] : memref<16x512xbf16, #tpu.memory_space<vmem>>, vector<16x512xbf16>
      tpu.vector_store %arg6[%c0_17, %c0_18], %24 {strides = array<i32>} : memref<16x512xbf16, #tpu.memory_space<vmem>>, vector<16x512xbf16>,
    } else {
    }
    return
  }
  func.func @transform_0(%arg0: i32, %arg1: i32, %arg2: i32) -> (i32, i32) {
    %c0_i32 = arith.constant 0 : i32
    return %arg0, %arg2 : i32, i32
  }
  func.func @transform_1(%arg0: i32, %arg1: i32, %arg2: i32) -> (i32, i32) {
    %c0_i32 = arith.constant 0 : i32
    return %arg2, %arg1 : i32, i32
  }
  func.func @transform_2(%arg0: i32, %arg1: i32, %arg2: i32) -> (i32, i32) {
    %c0_i32 = arith.constant 0 : i32
    %c0_i32_0 = arith.constant 0 : i32
    return %c0_i32, %arg1 : i32, i32
  }
  func.func @transform_3(%arg0: i32, %arg1: i32, %arg2: i32) -> (i32, i32) {
    %c0_i32 = arith.constant 0 : i32
    return %arg0, %arg1 : i32, i32
  }
}

module attributes {stable_mosaic.version = 11 : i64} {
  func.func @_linear_res_ln_kernel(%arg0: i32, %arg1: i32, %arg2: memref<16x512xbf16, #tpu.memory_space<vmem>>, %arg3: memref<512x128xbf16, #tpu.memory_space<vmem>>, %arg4: memref<1x128xf32, #tpu.memory_space<vmem>>, %arg5: memref<16x128xbf16, #tpu.memory_space<vmem>>, %arg6: memref<1x128xf32, #tpu.memory_space<vmem>>, %arg7: memref<1x128xf32, #tpu.memory_space<vmem>>, %arg8: memref<16x128xf32, #tpu.memory_space<vmem>>, %arg9: memref<16x128xf32, #tpu.memory_space<vmem>>) attributes {dimension_semantics = [#tpu.dimension_semantics<parallel>, #tpu.dimension_semantics<arbitrary>], iteration_bounds = array<i64: 1, 1>, scalar_prefetch = 0 : i64, scratch_operands = 1 : i64, tpu.core_type = #tpu.core_type<tc>, window_params = [{transform_indices = @transform_0, window_bounds = array<i64: 16, 512>}, {transform_indices = @transform_1, window_bounds = array<i64: 512, 128>}, {pipeline_mode = #tpu.pipeline_mode<synchronous>, transform_indices = @transform_2, window_bounds = array<i64: 1, 128>}, {transform_indices = @transform_3, window_bounds = array<i64: 16, 128>}, {pipeline_mode = #tpu.pipeline_mode<synchronous>, transform_indices = @transform_4, window_bounds = array<i64: 1, 128>}, {pipeline_mode = #tpu.pipeline_mode<synchronous>, transform_indices = @transform_5, window_bounds = array<i64: 1, 128>}, {transform_indices = @transform_6, window_bounds = array<i64: 16, 128>}]} {
    %c0_i32 = arith.constant 0 : i32
    %0 = arith.cmpi eq, %arg1, %c0_i32 : i32
    %1 = arith.extui %0 : i1 to i32
    %c0_i32_0 = arith.constant 0 : i32
    %2 = arith.cmpi ne, %1, %c0_i32_0 : i32
    scf.if %2 {
      %cst_10 = arith.constant 0.000000e+00 : f32
      %12 = vector.broadcast %cst_10 : f32 to vector<16x128xf32>
      %c0_11 = arith.constant 0 : index
      %c0_12 = arith.constant 0 : index
      %13 = vector.load %arg9[%c0_11, %c0_12] : memref<16x128xf32, #tpu.memory_space<vmem>>, vector<16x128xf32>
      tpu.vector_store %arg9[%c0_11, %c0_12], %12 {strides = array<i32>} : memref<16x128xf32, #tpu.memory_space<vmem>>, vector<16x128xf32>,
    } else {
    }
    %c0 = arith.constant 0 : index
    %c0_1 = arith.constant 0 : index
    %3 = vector.load %arg9[%c0, %c0_1] : memref<16x128xf32, #tpu.memory_space<vmem>>, vector<16x128xf32>
    %c0_2 = arith.constant 0 : index
    %c0_3 = arith.constant 0 : index
    %4 = vector.load %arg2[%c0_2, %c0_3] : memref<16x512xbf16, #tpu.memory_space<vmem>>, vector<16x512xbf16>
    %c0_4 = arith.constant 0 : index
    %c0_5 = arith.constant 0 : index
    %5 = vector.load %arg3[%c0_4, %c0_5] : memref<512x128xbf16, #tpu.memory_space<vmem>>, vector<512x128xbf16>
    %cst = arith.constant dense<0.000000e+00> : vector<16x128xf32>
    %6 = tpu.matmul %4, %5, %cst {dimension_numbers = #tpu.dot_dimension_numbers<[1], [0], [0], [1], [0, 0, 1, 1], [], []>} : vector<16x512xbf16>, vector<512x128xbf16>, vector<16x128xf32> -> vector<16x128xf32>
    %7 = arith.addf %3, %6 : vector<16x128xf32>
    %c0_6 = arith.constant 0 : index
    %c0_7 = arith.constant 0 : index
    %8 = vector.load %arg9[%c0_6, %c0_7] : memref<16x128xf32, #tpu.memory_space<vmem>>, vector<16x128xf32>
    tpu.vector_store %arg9[%c0_6, %c0_7], %7 {strides = array<i32>} : memref<16x128xf32, #tpu.memory_space<vmem>>, vector<16x128xf32>,
    %c0_i32_8 = arith.constant 0 : i32
    %9 = arith.cmpi eq, %arg1, %c0_i32_8 : i32
    %10 = arith.extui %9 : i1 to i32
    %c0_i32_9 = arith.constant 0 : i32
    %11 = arith.cmpi ne, %10, %c0_i32_9 : i32
    scf.if %11 {
      %c0_10 = arith.constant 0 : index
      %c0_11 = arith.constant 0 : index
      %12 = vector.load %arg9[%c0_10, %c0_11] : memref<16x128xf32, #tpu.memory_space<vmem>>, vector<16x128xf32>
      %c0_12 = arith.constant 0 : index
      %c0_13 = arith.constant 0 : index
      %13 = vector.load %arg4[%c0_12, %c0_13] : memref<1x128xf32, #tpu.memory_space<vmem>>, vector<1x128xf32>
      %14 = vector.broadcast %13 : vector<1x128xf32> to vector<16x128xf32>
      %15 = arith.addf %12, %14 : vector<16x128xf32>
      %c0_14 = arith.constant 0 : index
      %c0_15 = arith.constant 0 : index
      %16 = vector.load %arg5[%c0_14, %c0_15] : memref<16x128xbf16, #tpu.memory_space<vmem>>, vector<16x128xbf16>
      %17 = arith.extf %16 : vector<16x128xbf16> to vector<16x128xf32>
      %18 = arith.addf %15, %17 : vector<16x128xf32>
      %cst_16 = arith.constant dense<0.000000e+00> : vector<16xf32>
      %19 = vector.multi_reduction <add>, %18, %cst_16 [1] : vector<16x128xf32> to vector<16xf32>
      %20 = vector.shape_cast %19 : vector<16xf32> to vector<16x1xf32>
      %cst_17 = arith.constant 1.280000e+02 : f32
      %21 = vector.broadcast %cst_17 : f32 to vector<16x1xf32>
      %22 = arith.divf %20, %21 : vector<16x1xf32>
      %23 = arith.mulf %18, %18 : vector<16x128xf32>
      %cst_18 = arith.constant dense<0.000000e+00> : vector<16xf32>
      %24 = vector.multi_reduction <add>, %23, %cst_18 [1] : vector<16x128xf32> to vector<16xf32>
      %25 = vector.shape_cast %24 : vector<16xf32> to vector<16x1xf32>
      %cst_19 = arith.constant 1.280000e+02 : f32
      %26 = vector.broadcast %cst_19 : f32 to vector<16x1xf32>
      %27 = arith.divf %25, %26 : vector<16x1xf32>
      %28 = arith.mulf %22, %22 : vector<16x1xf32>
      %29 = arith.subf %27, %28 : vector<16x1xf32>
      %cst_20 = arith.constant 0.000000e+00 : f32
      %30 = vector.broadcast %cst_20 : f32 to vector<16x1xf32>
      %31 = arith.maximumf %29, %30 : vector<16x1xf32>
      %32 = vector.broadcast %22 : vector<16x1xf32> to vector<16x128xf32>
      %33 = arith.subf %18, %32 : vector<16x128xf32>
      %cst_21 = arith.constant 9.99999996E-13 : f32
      %34 = vector.broadcast %cst_21 : f32 to vector<16x1xf32>
      %35 = arith.addf %31, %34 : vector<16x1xf32>
      %36 = math.rsqrt %35 : vector<16x1xf32>
      %37 = vector.broadcast %36 : vector<16x1xf32> to vector<16x128xf32>
      %38 = arith.mulf %33, %37 : vector<16x128xf32>
      %c0_22 = arith.constant 0 : index
      %c0_23 = arith.constant 0 : index
      %39 = vector.load %arg6[%c0_22, %c0_23] : memref<1x128xf32, #tpu.memory_space<vmem>>, vector<1x128xf32>
      %40 = vector.broadcast %39 : vector<1x128xf32> to vector<16x128xf32>
      %41 = arith.mulf %38, %40 : vector<16x128xf32>
      %c0_24 = arith.constant 0 : index
      %c0_25 = arith.constant 0 : index
      %42 = vector.load %arg7[%c0_24, %c0_25] : memref<1x128xf32, #tpu.memory_space<vmem>>, vector<1x128xf32>
      %43 = vector.broadcast %42 : vector<1x128xf32> to vector<16x128xf32>
      %44 = arith.addf %41, %43 : vector<16x128xf32>
      %c0_26 = arith.constant 0 : index
      %c0_27 = arith.constant 0 : index
      %45 = vector.load %arg8[%c0_26, %c0_27] : memref<16x128xf32, #tpu.memory_space<vmem>>, vector<16x128xf32>
      tpu.vector_store %arg8[%c0_26, %c0_27], %44 {strides = array<i32>} : memref<16x128xf32, #tpu.memory_space<vmem>>, vector<16x128xf32>,
    } else {
    }
    return
  }
  func.func @transform_0(%arg0: i32, %arg1: i32) -> (i32, i32) {
    %c0_i32 = arith.constant 0 : i32
    return %arg0, %arg1 : i32, i32
  }
  func.func @transform_1(%arg0: i32, %arg1: i32) -> (i32, i32) {
    %c0_i32 = arith.constant 0 : i32
    %c0_i32_0 = arith.constant 0 : i32
    return %arg1, %c0_i32 : i32, i32
  }
  func.func @transform_2(%arg0: i32, %arg1: i32) -> (i32, i32) {
    %c0_i32 = arith.constant 0 : i32
    %c0_i32_0 = arith.constant 0 : i32
    %c0_i32_1 = arith.constant 0 : i32
    return %c0_i32, %c0_i32_0 : i32, i32
  }
  func.func @transform_3(%arg0: i32, %arg1: i32) -> (i32, i32) {
    %c0_i32 = arith.constant 0 : i32
    %c0_i32_0 = arith.constant 0 : i32
    return %arg0, %c0_i32 : i32, i32
  }
  func.func @transform_4(%arg0: i32, %arg1: i32) -> (i32, i32) {
    %c0_i32 = arith.constant 0 : i32
    %c0_i32_0 = arith.constant 0 : i32
    %c0_i32_1 = arith.constant 0 : i32
    return %c0_i32, %c0_i32_0 : i32, i32
  }
  func.func @transform_5(%arg0: i32, %arg1: i32) -> (i32, i32) {
    %c0_i32 = arith.constant 0 : i32
    %c0_i32_0 = arith.constant 0 : i32
    %c0_i32_1 = arith.constant 0 : i32
    return %c0_i32, %c0_i32_0 : i32, i32
  }
  func.func @transform_6(%arg0: i32, %arg1: i32) -> (i32, i32) {
    %c0_i32 = arith.constant 0 : i32
    %c0_i32_0 = arith.constant 0 : i32
    return %arg0, %c0_i32 : i32, i32
  }
}

</mosaic_0001>

<bundles_post_ra>
// kernel: bert_layer_tp_forward.5
= control target key start
LH: loop header
LB: loop body
LE: loop exit
PB: predicated region body
PF: predicated region fallthrough
CT: control target
= control target key end

     0   :  { %8 = vsyncpa [#allocation4], 0  ;;  %s458_s15 = smov [#allocation3]   ;;  %s459_s17 = smov 192   ;;  %s502_s0 = inlined_call_operand.vmem [shape: bf16[16,128], index: 0, kind: input, shape index: {}]   ;;  %s503_s1 = inlined_call_operand.hbm [shape: bf16[128,384], index: 1, kind: input, shape index: {}]   ;;  %s504_s2 = inlined_call_operand.vmem [shape: f32[1,384], index: 2, kind: input, shape index: {}]   ;;  %s505_s3 = inlined_call_operand.vmem [shape: bf16[16,384], index: 3, kind: output, shape index: {}]  }
   0x1   :  { %s15_s14 = sshll.u32 %s503_s1, 4  ;;  %s17_s16 = sshll.u32 %s458_s15, 4  ;;  %s16_s14 = int_to_ptr.hbm [resolvable:$true] %s15_s14  ;;  %s18_s16 = int_to_ptr.vmem [resolvable:$true] %s17_s16 }
   0x2   :  { %s460_s18 = smov 12  }
   0x3   :  { %23 = dma.hbm_to_vmem [thread:$0]  %s16_s14, 3072, %s18_s16, [#allocation4], %s459_s17, %s459_s17, %s460_s18  }
   0x4   :  { %456 = dma.done.wait [#allocation4], 3072  }
   0x5   :  { %457 = vsyncadd [#allocation4], 4294964224  ;;  %v394_v0 = vld [vmem:[#allocation3 + $0xa8] sm:$0xf]  ;;  %v427_v1 = vld [vmem:[#allocation3 + $0xb0] sm:$0xf0] }
   0x6   :  { %v426_v2 = vld [vmem:[#allocation3 + $0xac] sm:$0xf]  ;;  %v395_v3 = vor.u32 %v427_v1, %v394_v0  ;;  %v396_v4 = vld [vmem:[#allocation3 + $0xb4] sm:$0xf0]  ;;  %v402_v5 = vld [vmem:[#allocation3 + $0xb0] sm:$0xf] }
   0x7   :  { %v428_v6 = vld [vmem:[#allocation3 + $0xb8] sm:$0xf0]  ;;  %v399_v7 = vor.u32 %v426_v2, %v396_v4  ;;  %v382_v9 = vld [vmem:[#allocation3 + $0x90] sm:$0xf]  ;;  %v423_v11 = vld [vmem:[#allocation3 + $0x94] sm:$0xf] }
   0x8   :  { %v403_v8 = vor.u32 %v428_v6, %v402_v5  ;;  %v424_v10 = vld [vmem:[#allocation3 + $0x98] sm:$0xf0]  ;;  %214 = vmatpush.bf16.msra.mxu0 %v395_v3  ;;  %v384_v13 = vld [vmem:[#allocation3 + $0x9c] sm:$0xf0]  ;;  %v390_v14 = vld [vmem:[#allocation3 + $0x98] sm:$0xf] }
   0x9   :  { %v383_v12 = vor.u32 %v424_v10, %v382_v9  ;;  %v425_v15 = vld [vmem:[#allocation3 + $0xa0] sm:$0xf0]  ;;  %228 = vmatpush.bf16.msra.mxu1 %v399_v7  ;;  %v387_v16 = vor.u32 %v423_v11, %v384_v13  ;;  %v370_v18 = vld [vmem:[#allocation3 + $0x78] sm:$0xf]  ;;  %v420_v20 = vld [vmem:[#allocation3 + $0x7c] sm:$0xf] }
   0xa   :  { %242 = vmatpush.bf16.msra.mxu2 %v403_v8  ;;  %v391_v17 = vor.u32 %v425_v15, %v390_v14  ;;  %v421_v19 = vld [vmem:[#allocation3 + $0x80] sm:$0xf0]  ;;  %v372_v21 = vld [vmem:[#allocation3 + $0x84] sm:$0xf0]  ;;  %v378_v22 = vld [vmem:[#allocation3 + $0x80] sm:$0xf] }
   0xb   :  { %v422_v23 = vld [vmem:[#allocation3 + $0x88] sm:$0xf0]  ;;  %v371_v24 = vor.u32 %v421_v19, %v370_v18  ;;  %v375_v25 = vor.u32 %v420_v20, %v372_v21  ;;  %v358_v27 = vld [vmem:[#allocation3 + $0x60] sm:$0xf]  ;;  %v417_v29 = vld [vmem:[#allocation3 + $0x64] sm:$0xf] }
   0xc   :  { %215 = vmatpush.bf16.msra.mxu0 %v383_v12  ;;  %v379_v26 = vor.u32 %v422_v23, %v378_v22  ;;  %v418_v28 = vld [vmem:[#allocation3 + $0x68] sm:$0xf0]  ;;  %v360_v30 = vld [vmem:[#allocation3 + $0x6c] sm:$0xf0]  ;;  %v366_v31 = vld [vmem:[#allocation3 + $0x68] sm:$0xf] }
   0xd   :  { %229 = vmatpush.bf16.msra.mxu1 %v387_v16  ;;  %v419_v32 = vld [vmem:[#allocation3 + $0x70] sm:$0xf0]  ;;  %v359_v33 = vor.u32 %v418_v28, %v358_v27  ;;  %v363_v34 = vor.u32 %v417_v29, %v360_v30  ;;  %v346_v36 = vld [vmem:[#allocation3 + $0x48] sm:$0xf]  ;;  %v414_v38 = vld [vmem:[#allocation3 + $0x4c] sm:$0xf] }
   0xe   :  { %243 = vmatpush.bf16.msra.mxu2 %v391_v17  ;;  %v367_v35 = vor.u32 %v419_v32, %v366_v31  ;;  %v415_v37 = vld [vmem:[#allocation3 + $0x50] sm:$0xf0]  ;;  %v348_v39 = vld [vmem:[#allocation3 + $0x54] sm:$0xf0]  ;;  %v354_v40 = vld [vmem:[#allocation3 + $0x50] sm:$0xf] }
   0xf   :  { %v416_v41 = vld [vmem:[#allocation3 + $0x58] sm:$0xf0]  ;;  %v347_v42 = vor.u32 %v415_v37, %v346_v36  ;;  %v351_v43 = vor.u32 %v414_v38, %v348_v39  ;;  %v334_v45 = vld [vmem:[#allocation3 + $0x30] sm:$0xf]  ;;  %v411_v47 = vld [vmem:[#allocation3 + $0x34] sm:$0xf] }
  0x10   :  { %216 = vmatpush.bf16.msra.mxu0 %v371_v24  ;;  %v355_v44 = vor.u32 %v416_v41, %v354_v40  ;;  %v412_v46 = vld [vmem:[#allocation3 + $0x38] sm:$0xf0]  ;;  %v336_v48 = vld [vmem:[#allocation3 + $0x3c] sm:$0xf0]  ;;  %v342_v49 = vld [vmem:[#allocation3 + $0x38] sm:$0xf] }
  0x11   :  { %230 = vmatpush.bf16.msra.mxu1 %v375_v25  ;;  %v413_v50 = vld [vmem:[#allocation3 + $0x40] sm:$0xf0]  ;;  %v335_v51 = vor.u32 %v412_v46, %v334_v45  ;;  %v339_v52 = vor.u32 %v411_v47, %v336_v48  ;;  %v322_v54 = vld [vmem:[#allocation3 + $0x18] sm:$0xf]  ;;  %v408_v56 = vld [vmem:[#allocation3 + $0x1c] sm:$0xf] }
  0x12   :  { %244 = vmatpush.bf16.msra.mxu2 %v379_v26  ;;  %v343_v53 = vor.u32 %v413_v50, %v342_v49  ;;  %v409_v55 = vld [vmem:[#allocation3 + $0x20] sm:$0xf0]  ;;  %v324_v57 = vld [vmem:[#allocation3 + $0x24] sm:$0xf0]  ;;  %v330_v58 = vld [vmem:[#allocation3 + $0x20] sm:$0xf] }
  0x13   :  { %v410_v59 = vld [vmem:[#allocation3 + $0x28] sm:$0xf0]  ;;  %v323_v60 = vor.u32 %v409_v55, %v322_v54  ;;  %v327_v61 = vor.u32 %v408_v56, %v324_v57  ;;  %v310_v63 = vld [vmem:[#allocation3] sm:$0xf]  ;;  %v405_v1 = vld [vmem:[#allocation3 + $0x4] sm:$0xf] }
  0x14   :  { %217 = vmatpush.bf16.msra.mxu0 %v359_v33  ;;  %v331_v62 = vor.u32 %v410_v59, %v330_v58  ;;  %v406_v0 = vld [vmem:[#allocation3 + $0x8] sm:$0xf0]  ;;  %v312_v2 = vld [vmem:[#allocation3 + $0xc] sm:$0xf0]  ;;  %v318_v3 = vld [vmem:[#allocation3 + $0x8] sm:$0xf] }
  0x15   :  { %231 = vmatpush.bf16.msra.mxu1 %v363_v34  ;;  %v407_v4 = vld [vmem:[#allocation3 + $0x10] sm:$0xf0]  ;;  %v311_v5 = vor.u32 %v406_v0, %v310_v63  ;;  %v315_v6 = vor.u32 %v405_v1, %v312_v2  ;;  %v404_v8 = vld [vmem:[%s502_s0] sm:$0xff] }
  0x16   :  { %245 = vmatpush.bf16.msra.mxu2 %v367_v35  ;;  %v319_v7 = vor.u32 %v407_v4, %v318_v3  ;;  %v277_v9 = vld [vmem:[%s504_s2] sm:$0x7] }
  0x17   :  { %v279_v10 = vperm.slane %v277_v9, 0  ;;  %v280_v11 = vperm.slane %v277_v9, 1  ;;  %v281_v17 = vperm.slane %v277_v9, 2 }
  0x18   :  { %218 = vmatpush.bf16.msra.mxu0 %v347_v42 }
  0x19   :  { %232 = vmatpush.bf16.msra.mxu1 %v351_v43 }
  0x1a   :  { %246 = vmatpush.bf16.msra.mxu2 %v355_v44 }
  0x1c   :  { %219 = vmatpush.bf16.msra.mxu0 %v335_v51 }
  0x1d   :  { %233 = vmatpush.bf16.msra.mxu1 %v339_v52 }
  0x1e   :  { %247 = vmatpush.bf16.msra.mxu2 %v343_v53 }
  0x20   :  { %220 = vmatpush.bf16.msra.mxu0 %v323_v60 }
  0x21   :  { %234 = vmatpush.bf16.msra.mxu1 %v327_v61 }
  0x22   :  { %248 = vmatpush.bf16.msra.mxu2 %v331_v62 }
  0x24   :  { %221 = vmatpush.bf16.msra.mxu0 %v311_v5 }
  0x25   :  { %235 = vmatpush.bf16.msra.mxu1 %v315_v6 }
  0x26   :  { %249 = vmatpush.bf16.msra.mxu2 %v319_v7 }
  0x27   :  { %222 = vmatmul.bf16.vlgmr.msra.gmra.mxu0 %v404_v8 }
  0x28   :  { %236 = vmatmul.bf16.vlgmr.msra.gmra.mxu1 %v404_v8 }
  0x29   :  { %250 = vmatmul.bf16.vlgmr.msra.gmra.mxu2 %v404_v8 }
  0xa4   :  { %v223_v12 = vpop.f32.mrf.mxu0 }
  0xa5   :  { %v285_v13 = vadd.f32 %v279_v10, %v223_v12  ;;  %v237_v14 = vpop.f32.mrf.mxu1 }
  0xa6   :  { %v286_v15 = vadd.f32 %v280_v11, %v237_v14 }
  0xa8   :  { %v291_v16 = vpack.c.bf16 %v286_v15, %v285_v13 }
  0xaa   :  { %295 = vst [vmem:[%s505_s3] sm:$0xff] %v291_v16 }
  0xac   :  { %v251_v18 = vpop.f32.mrf.mxu2  ;;  %v225_v20 = vpop.f32.mrf.mxu0 }
  0xad   :  { %v287_v19 = vadd.f32 %v281_v17, %v251_v18  ;;  %v288_v21 = vadd.f32 %v279_v10, %v225_v20  ;;  %v239_v22 = vpop.f32.mrf.mxu1 }
  0xae   :  { %v289_v24 = vadd.f32 %v280_v11, %v239_v22 }
  0xaf   :  { %v292_v23 = vpack.c.bf16 %v287_v19, %v287_v19 }
  0xb0   :  { %v293_v25 = vpack.c.bf16 %v289_v24, %v288_v21 }
  0xb1   :  { %296 = vst [vmem:[%s505_s3 + $0x8] sm:$0xf] %v292_v23 }
  0xb2   :  { %297 = vst [vmem:[%s505_s3 + $0xc] sm:$0xff] %v293_v25 }
  0xb4   :  { %v253_v26 = vpop.f32.mrf.mxu2 }
  0xb5   :  { %v290_v27 = vadd.f32 %v281_v17, %v253_v26 }
  0xb7   :  { %v294_v28 = vpack.c.bf16 %v290_v27, %v290_v27 }
  0xb9   :  { %298 = vst [vmem:[%s505_s3 + $0x14] sm:$0xf] %v294_v28 }
  0xba   :  { %303 = vsyncpa [#allocation4], 1 }

// kernel: bert_layer_tp_forward.7
= control target key start
LH: loop header
LB: loop body
LE: loop exit
PB: predicated region body
PF: predicated region fallthrough
CT: control target
= control target key end

     0   :  { %11 = vsyncpa [#allocation4], 0  ;;  %s321_s24 = smov [#allocation3]   ;;  %s322_s26 = smov 64   ;;  %s381_s0 = inlined_call_operand.vmem [shape: bf16[16,128], index: 0, kind: input, shape index: {}]   ;;  %s382_s1 = inlined_call_operand.hbm [shape: bf16[128,128], index: 1, kind: input, shape index: {}]   ;;  %s383_s2 = inlined_call_operand.vmem [shape: f32[1,128], index: 2, kind: input, shape index: {}]   ;;  %s384_s3 = inlined_call_operand.vmem [shape: bf16[16,128], index: 3, kind: input, shape index: {}]   ;;  %s385_s4 = inlined_call_operand.vmem [shape: f32[1,128], index: 4, kind: input, shape index: {}]   ;;  %s386_s5 = inlined_call_operand.vmem [shape: f32[1,128], index: 5, kind: input, shape index: {}]   ;;  %s387_s6 = inlined_call_operand.vmem [shape: bf16[16,128], index: 6, kind: output, shape index: {}]  }
   0x1   :  { %s18_s23 = sshll.u32 %s382_s1, 4  ;;  %s20_s25 = sshll.u32 %s321_s24, 4  ;;  %s19_s23 = int_to_ptr.hbm [resolvable:$true] %s18_s23  ;;  %s21_s25 = int_to_ptr.vmem [resolvable:$true] %s20_s25 }
   0x2   :  { %s323_s27 = smov 4  }
   0x3   :  { %26 = dma.hbm_to_vmem [thread:$0]  %s19_s23, 1024, %s21_s25, [#allocation4], %s322_s26, %s322_s26, %s323_s27  }
   0x4   :  { %319 = dma.done.wait [#allocation4], 1024  }
   0x5   :  { %320 = vsyncadd [#allocation4], 4294966272  ;;  %v272_v0 = vld [vmem:[#allocation3 + $0x38] sm:$0xff]  ;;  %v271_v1 = vld [vmem:[#allocation3 + $0x30] sm:$0xff]  ;;  %v324_v21 = vmov 128.0  }
   0x6   :  { %119 = vmatpush.bf16.msra.mxu0 %v272_v0  ;;  %v270_v2 = vld [vmem:[#allocation3 + $0x28] sm:$0xff]  ;;  %v269_v3 = vld [vmem:[#allocation3 + $0x20] sm:$0xff]  ;;  %v268_v4 = vld [vmem:[#allocation3 + $0x18] sm:$0xff]  ;;  %289 = vrcp.f32 %v324_v21 }
   0x7   :  { %v267_v5 = vld [vmem:[#allocation3 + $0x10] sm:$0xff]  ;;  %v266_v6 = vld [vmem:[#allocation3 + $0x8] sm:$0xff]  ;;  %v265_v7 = vld [vmem:[#allocation3] sm:$0xff] }
   0x8   :  { %v264_v8 = vld [vmem:[%s381_s0] sm:$0xff] }
   0x9   :  { %v274_v9 = vld [vmem:[%s384_s3] sm:$0xff]  }
   0xa   :  { %120 = vmatpush.bf16.msra.mxu0 %v271_v1  ;;  %v286_v10 = vld [vmem:[%s383_s2] ss:$0 sm:$0xff]  ;;  %v275_v11 = vunpack.c.l.bf16 %v274_v9  ;;  %v276_v16 = vunpack.c.h.bf16 %v274_v9 }
   0xb   :  { %v287_v57 = vld [vmem:[%s385_s4] ss:$0 sm:$0xff] }
   0xc   :  { %v290_v22 = vpop.eup %289  ;;  %v288_v62 = vld [vmem:[%s386_s5] ss:$0 sm:$0xff] }
   0xd   :  { %v159_v23 = vmul.f32 128.0, %v290_v22  ;;  %vm163_vm0 = vweird.f32 %v290_v22 }
   0xe   :  { %121 = vmatpush.bf16.msra.mxu0 %v270_v2 }
   0xf   :  { %v160_v24 = vsub.f32 1.0, %v159_v23 }
  0x11   :  { %v161_v25 = vmul.f32 %v290_v22, %v160_v24 }
  0x12   :  { %122 = vmatpush.bf16.msra.mxu0 %v269_v3 }
  0x13   :  { %v162_v26 = vadd.f32 %v290_v22, %v161_v25 }
  0x15   :  { %v164_v27 = vsel %vm163_vm0, %v290_v22, %v162_v26 }
  0x16   :  { %123 = vmatpush.bf16.msra.mxu0 %v268_v4 }
  0x1a   :  { %124 = vmatpush.bf16.msra.mxu0 %v267_v5 }
  0x1e   :  { %125 = vmatpush.bf16.msra.mxu0 %v266_v6 }
  0x22   :  { %126 = vmatpush.bf16.msra.mxu0 %v265_v7 }
  0x25   :  { %127 = vmatmul.bf16.vlgmr.msra.gmra.mxu0 %v264_v8 }
  0xa2   :  { %v128_v12 = vpop.f32.mrf.mxu0 }
  0xa3   :  { %v146_v13 = vadd.f32 %v286_v10, %v128_v12 }
  0xa5   :  { %v152_v14 = vadd.f32 %v275_v11, %v146_v13 }
  0xa7   :  { %154 = vadd.xlane.f32.xlu0 %v152_v14  ;;  %v167_v15 = vmul.f32 %v152_v14, %v152_v14 }
  0xa9   :  { %169 = vadd.xlane.f32.xlu1 %v167_v15 }
  0xaa   :  { %v130_v17 = vpop.f32.mrf.mxu0 }
  0xab   :  { %v147_v18 = vadd.f32 %v286_v10, %v130_v17 }
  0xad   :  { %v153_v19 = vadd.f32 %v276_v16, %v147_v18 }
  0xaf   :  { %156 = vadd.xlane.f32.xlu0 %v153_v19  ;;  %v168_v20 = vmul.f32 %v153_v19, %v153_v19 }
  0xb1   :  { %171 = vadd.xlane.f32.xlu1 %v168_v20 }
 0x11a   :  { %v155_v28 = vpop.xlane.xlu0 %154 }
 0x11b   :  { %v165_v29 = vmul.f32 %v164_v27, %v155_v28 }
 0x11c   :  { %v170_v30 = vpop.xlane.xlu1 %169 }
 0x11d   :  { %v175_v31 = vmul.f32 %v165_v29, %v165_v29  ;;  %v173_v32 = vmul.f32 %v170_v30, %v164_v27  ;;  %v181_v55 = vsub.f32 %v152_v14, %v165_v29 }
 0x11f   :  { %v177_v33 = vsub.f32 %v173_v32, %v175_v31 }
 0x121   :  { %v179_v34 = vmax.f32 %v177_v33, 0.0 }
 0x122   :  { %v157_v35 = vpop.xlane.xlu0 %156 }
 0x123   :  { %v183_v36 = vadd.f32 1e-12, %v179_v34  ;;  %v166_v37 = vmul.f32 %v164_v27, %v157_v35 }
 0x124   :  { %v172_v38 = vpop.xlane.xlu1 %171 }
 0x125   :  { %291 = vrsqrt.f32 %v183_v36  ;;  %v176_v39 = vmul.f32 %v166_v37, %v166_v37  ;;  %v174_v40 = vmul.f32 %v172_v38, %v164_v27  ;;  %vm191_vm2 = vweird.f32 %v183_v36 }
 0x126   :  { %v182_v60 = vsub.f32 %v153_v19, %v166_v37 }
 0x127   :  { %v178_v41 = vsub.f32 %v174_v40, %v176_v39 }
 0x129   :  { %v180_v42 = vmax.f32 %v178_v41, 0.0 }
 0x12b   :  { %v292_v43 = vpop.eup %291  ;;  %v184_v45 = vadd.f32 1e-12, %v180_v42 }
 0x12c   :  { %v186_v44 = vmul.f32 %v292_v43, %v183_v36  ;;  %vm192_vm1 = vweird.f32 %v292_v43 }
 0x12d   :  { %293 = vrsqrt.f32 %v184_v45  ;;  %vm193_vm3 = vmor %vm191_vm2, %vm192_vm1  ;;  %vm201_vm5 = vweird.f32 %v184_v45 }
 0x12e   :  { %v187_v46 = vmul.f32 %v292_v43, %v186_v44 }
 0x130   :  { %v188_v47 = vmul.f32 0.5, %v187_v46 }
 0x132   :  { %v189_v48 = vsub.f32 1.5, %v188_v47 }
 0x133   :  { %v294_v49 = vpop.eup %293 }
 0x134   :  { %v190_v50 = vmul.f32 %v292_v43, %v189_v48  ;;  %v196_v51 = vmul.f32 %v294_v49, %v184_v45  ;;  %vm202_vm4 = vweird.f32 %v294_v49 }
 0x135   :  { %vm203_vm6 = vmor %vm201_vm5, %vm202_vm4 }
 0x136   :  { %v197_v52 = vmul.f32 %v294_v49, %v196_v51  ;;  %v194_v53 = vsel %vm193_vm3, %v292_v43, %v190_v50 }
 0x137   :  { %v205_v58 = vmul.f32 %v194_v53, %v181_v55 }
 0x138   :  { %v198_v54 = vmul.f32 0.5, %v197_v52 }
 0x139   :  { %v211_v63 = vmul.f32 %v287_v57, %v205_v58 }
 0x13a   :  { %v199_v56 = vsub.f32 1.5, %v198_v54 }
 0x13b   :  { %v217_v2 = vadd.f32 %v288_v62, %v211_v63 }
 0x13c   :  { %v200_v59 = vmul.f32 %v294_v49, %v199_v56 }
 0x13e   :  { %v204_v61 = vsel %vm203_vm6, %v294_v49, %v200_v59 }
 0x13f   :  { %v206_v0 = vmul.f32 %v204_v61, %v182_v60 }
 0x141   :  { %v212_v1 = vmul.f32 %v287_v57, %v206_v0 }
 0x143   :  { %v218_v3 = vadd.f32 %v288_v62, %v212_v1 }
 0x145   :  { %v280_v4 = vpack.c.bf16 %v218_v3, %v217_v2 }
 0x147   :  { %281 = vst [vmem:[%s387_s6] sm:$0xff] %v280_v4  }
 0x148   :  { %227 = vsyncpa [#allocation4], 1 }

// kernel: bert_layer_tp_forward.6
= control target key start
LH: loop header
LB: loop body
LE: loop exit
PB: predicated region body
PF: predicated region fallthrough
CT: control target
= control target key end

     0   :  { %s915_s18 = smov [#allocation6]   ;;  %s1101_s0 = inlined_call_operand.vmem [shape: s32[2], index: 0, kind: input, shape index: {}]   ;;  %s1102_s1 = inlined_call_operand.vmem [shape: bf16[2,8,384], index: 1, kind: input, shape index: {}, may-alias: {1,2}]   ;;  %s1103_s2 = inlined_call_operand.vmem [shape: bf16[2,8,384], index: 2, kind: input, shape index: {}, may-alias: {1,2}]   ;;  %s1104_s3 = inlined_call_operand.vmem [shape: f32[2,1,8], index: 3, kind: input, shape index: {}]   ;;  %s1105_s4 = inlined_call_operand.vmem [shape: bf16[2,8,128], index: 4, kind: output, shape index: {}]  }
   0x1   :  { %s10_s17 = sshll.u32 %s1101_s0, 4  ;;  %s11_s17 = int_to_ptr.vmem [resolvable:$true] %s10_s17 }
   0x2   :  { %13 = dma.vmem_to_smem %s11_s17, 16, %s915_s18, [#allocation5] }
   0x3   :  { %901 = dma.done.wait [#allocation5], 16 }
   0x4   :  { %902 = vsyncadd [#allocation5], 4294967280 }
   0x5   :  { %16 = sfence }
   0x6   :  { %s957_s19 = smov 0   ;;  %s959_s20 = smov 0  }
   0x7   :  { %s961_s21 = smov 0  }
   0x8 LB: > { %s41_s0 = sadd.s32 1, %s909_s20  ;;  %p788_p0 = scmp.ge.s32.totalorder %s913_s21, 1  ;;  %s913_s21 = sphi %s961_s21, %s22_s21   ;;  %s909_s20 = sphi %s959_s20, %s1107_s20   ;;  %s905_s19 = sphi %s957_s19, %s1106_s19  }
   0x9   : > { %p43_p1 = scmp.ge.s32.totalorder %s41_s0, 2  ;;  %p203_p2 = scmp.lt.s32.totalorder %s913_s21, 3 }
   0xb   : > { %s1109_s0 = smov (%p43_p1, %s41_s0), 0  ;;  %p204_p3 = pnand %p788_p0, %p203_p2 }
   0xc   : > { %p249_p4 = scmp.lt.s32.totalorder (!%p204_p3), %s905_s19, 1  ;;  %s291_s22 = sld [smem:[#allocation6 + %s905_s19]] (!%p204_p3) }
   0xd   : > { %207 = sbr.rel (%p204_p3) target bundleno = 1206 (0x4b6), region = 32 }
  0x12   : > { %vm286_vm0 = vcmask 31744   ;;  %v916_v0 = vmov -inf   ;;  %s1111_s19 = smov (!%p249_p4, %s905_s19), 1  ;;  %v917_v1 = vmov 0.0   ;;  %p793_p5 = scmp.le.s32.totalorder %s291_s22, 0 }
  0x13   : > { %287 = vst.msk [vmem:[#allocation2] sm:$0xff] %vm286_vm0, %v916_v0  ;;  %s789_s23 = smul.u32 12, %s1111_s19  ;;  %s273_s26 = scalar_lea.vmem %s1104_s3, %s1111_s19 }
  0x14   : > { %288 = vst.msk [vmem:[#allocation3] sm:$0xff] %vm286_vm0, %v917_v1  ;;  %s791_s27 = sshll.u32 %s1111_s19, 2  ;;  %295 = sbr.rel (%p793_p5) target bundleno = 1064 (0x428), region = 40 }
  0x15   : > { %289 = vst [vmem:[#allocation4] sm:$0xff] %v917_v1  ;;  %s723_s30 = scalar_lea.vmem %s1102_s1, %s789_s23  ;;  %s986_s7 = scalar_lea.vmem %s1103_s2, %s789_s23 }
  0x16   : > { %s991_s10 = scalar_lea.vmem %s1105_s4, %s791_s27  ;;  %s918_s11 = smov (!%p793_p5), 64  }
  0x17   : > { %s919_s12 = smov (!%p793_p5), 32   ;;  %s920_s13 = smov (!%p793_p5), 96  }
  0x19   : > { %v303_v2 = vld [vmem:[%s986_s7] sm:$0xf]  ;;  %vm308_vm1 = vcmask 261120   ;;  %v794_v3 = vld [vmem:[%s723_s30 + $0x8] sm:$0xf]  ;;  %vm328_vm2 = vcmask 64512  }
  0x1a   : > { %v313_v4 = vsel %vm308_vm1, %v303_v2, 0  ;;  %v298_v5 = vunpack.c.l.bf16 %v794_v3  ;;  %v384_v8 = vunpack.c.l.b16 %v303_v2  ;;  %v996_v9 = vld [vmem:[%s273_s26] ss:$0 sm:$0xff]  ;;  %v921_v15 = vmov 0   ;;  %v304_v24 = vld [vmem:[%s986_s7 + $0x4] sm:$0xf] }
  0x1b   : > { %322 = vmatpush.bf16.xpose.msra.mxu0 %v313_v4  ;;  %844 = vset.pattern.permute.xlu1 %v921_v15  ;;  %v1005_v18 = vld [vmem:[#allocation2] sm:$0xff]  ;;  %vm353_vm3 = vcmask 1043456   ;;  %v429_v50 = vunpack.c.l.b16 %v304_v24  ;;  %v922_v54 = vmov 1   ;;  %v923_v55 = vmov 2  }
  0x1c   : > { %v299_v6 = vmul.f32 0.17675781, %v298_v5  ;;  %v385_v11 = vpack.c.b16 %v384_v8, %v384_v8  ;;  %v355_v25 = vsel %vm353_vm3, %v304_v24, 0  ;;  %845 = vset.pattern.permute.xlu2 %v922_v54  ;;  %846 = vset.pattern.permute.xlu0 %v923_v55  ;;  %v924_v60 = vmov 3  }
  0x1d   : > { %364 = vmatpush.bf16.msra.mxu1 %v355_v25  ;;  %v430_v52 = vpack.c.b16 %v429_v50, %v429_v50  ;;  %vm615_vm4 = vcmask 7168   ;;  %vm617_vm5 = vcmask 15360   ;;  %vm619_vm6 = vcmask 23552  }
  0x1e   : > { %v300_v7 = vpack.c.bf16 %v299_v6, %v299_v6  ;;  %465 = vrot.lane.b32.xlu2 %v385_v11, %s918_s11  ;;  %vm628_vm7 = vcmask 523264   ;;  %vm630_vm8 = vcmask 785408  }
  0x20   : > { %v379_v16 = vunpack.c.l.b16 %v300_v7 }
  0x22   : > { %795 = vmatmul.msk.bf16.vlgmr.msra.gmra.mxu0 %vm308_vm1, %v300_v7  ;;  %v380_v17 = vpack.c.b16 %v379_v16, %v379_v16 }
  0x26   : > { %541 = vrot.lane.b32.xlu2 %v385_v11, %s919_s12 }
  0x2e   : > { %539 = vrot.lane.b32.xlu2 %v380_v17, %s919_s12 }
  0x78   : > { %v466_v23 = vpop.permute.xlu2 %465 }
  0x79   : > { %v471_v27 = vsel %vm308_vm1, %v466_v23, 0 }
  0x7a   : > { %480 = vmatpush.bf16.xpose.msrb.mxu1 %v471_v27 }
  0x80   : > { %v542_v26 = vpop.permute.xlu2 %541 }
  0x81   : > { %v547_v28 = vsel %vm308_vm1, %v542_v26, 0 }
  0x82   : > { %556 = vmatpush.bf16.xpose.msrb.mxu0 %v547_v28 }
  0x88   : > { %v540_v29 = vpop.permute.xlu2 %539 }
  0x89   : > { %801 = vmatmul.msk.bf16.vlgmr.msrb.gmra.mxu0 %vm308_vm1, %v540_v29 }
  0x9f   : > { %v324_v10 = vpop.f32.mrf.mxu0 }
  0xa0   : > { %v325_v12 = vadd.f32 %v996_v9, %v324_v10 }
  0xa2   : > { %v329_v13 = vsel %vm328_vm2, %v325_v12, -inf }
  0xa3   : > { %330 = vmax.xlane.f32.xlu0 %v329_v13 }
  0xa7   : > { %v326_v14 = vpop.f32.mrf.mxu0 }
  0xb7   : > { %386 = vrot.lane.b32.xlu0 %v385_v11, %s920_s13 }
 0x106   : > { %v558_v37 = vpop.f32.mrf.mxu0 }
 0x107   : > { %v1023_v38 = vadd.f32 %v996_v9, %v558_v37 }
 0x109   : > { %v562_v39 = vsel %vm328_vm2, %v1023_v38, -inf }
 0x10a   : > { %563 = vmax.xlane.f32.xlu0 %v562_v39 }
 0x10e   : > { %v560_v40 = vpop.f32.mrf.mxu0 }
 0x116   : > { %v331_v19 = vpop.xlane.xlu0 %330 }
 0x117   : > { %v1008_v20 = vmax.f32 %v1005_v18, %v331_v19 }
 0x119   : > { %338 = vperm.xlu1 %844, %v1008_v20   ;;  %v333_v61 = vsub.f32 %v1005_v18, %v1008_v20 }
 0x11b   : > { %v334_v0 = vmul.f32 1.442695, %v333_v61 }
 0x121   : > { %381 = vrot.lane.b32.xlu1 %v380_v17, %s920_s13 }
 0x122   : > { %850 = vset.pattern.permute.xlu1 %v923_v55 }
 0x129   : > { %463 = vrot.lane.b32.xlu1 %v380_v17, %s918_s11  ;;  %v387_v21 = vpop.permute.xlu0 %386 }
 0x12a   : > { %v392_v22 = vsel %vm308_vm1, %v387_v21, 0 }
 0x12b   : > { %401 = vmatpush.bf16.xpose.msra.mxu2 %v392_v22 }
 0x17d   : > { %v564_v58 = vpop.xlane.xlu0 %563 }
 0x17e   : > { %v1044_v59 = vmax.f32 %v1005_v18, %v564_v58 }
 0x18b   : > { %v339_v30 = vpop.permute.xlu1 %338 }
 0x18c   : > { %v341_v31 = vsub.f32 %v325_v12, %v339_v30 }
 0x18e   : > { %v342_v32 = vmul.f32 1.442695, %v341_v31 }
 0x190   : > { %854 = vpow2.f32 %v342_v32 }
 0x191   : > { %856 = vpow2.f32 %v334_v0 }
 0x193   : > { %v382_v33 = vpop.permute.xlu1 %381 }
 0x194   : > { %797 = vmatmul.msk.bf16.vlgmr.msra.gmra.mxu2 %vm308_vm1, %v382_v33 }
 0x196   : > { %v855_v34 = vpop.eup %854 }
 0x197   : > { %v349_v35 = vpack.c.bf16 %v855_v34, %v855_v34  ;;  %v345_v53 = vsel %vm328_vm2, %v855_v34, 0.0  ;;  %v1060_v8 = vpop.eup %856 }
 0x199   : > { %796 = vmatmul.msk.bf16.vlgmr.msra.gmra.mxu1 %vm328_vm2, %v349_v35 }
 0x19b   : > { %v464_v36 = vpop.permute.xlu1 %463 }
 0x1a9   : > { %799 = vmatmul.msk.bf16.vlgmr.msrb.gmra.mxu1 %vm308_vm1, %v464_v36 }
 0x216   : > { %v1027_v41 = vpop.f32.mrf.mxu1 }
 0x217   : > { %v403_v42 = vpop.f32.mrf.mxu2 }
 0x218   : > { %v1030_v43 = vadd.f32 %v996_v9, %v403_v42 }
 0x21a   : > { %v407_v44 = vsel %vm328_vm2, %v1030_v43, -inf }
 0x21b   : > { %408 = vmax.xlane.f32.xlu1 %v407_v44 }
 0x21e   : > { %v368_v45 = vpop.f32.mrf.mxu1 }
 0x21f   : > { %v405_v46 = vpop.f32.mrf.mxu2 }
 0x226   : > { %v482_v47 = vpop.f32.mrf.mxu1 }
 0x227   : > { %v1035_v48 = vadd.f32 %v996_v9, %v482_v47 }
 0x229   : > { %v486_v49 = vsel %vm328_vm2, %v1035_v48, -inf }
 0x22a   : > { %487 = vmax.xlane.f32.xlu2 %v486_v49 }
 0x22e   : > { %v484_v51 = vpop.f32.mrf.mxu1 }
 0x234   : > { %431 = vrot.lane.b32.xlu1 %v430_v52, %s920_s13 }
 0x23c   : > { %507 = vrot.lane.b32.xlu1 %v430_v52, %s918_s11 }
 0x266   : > { %346 = vadd.xlane.f32.xlu1 %v345_v53 }
 0x28e   : > { %v409_v56 = vpop.xlane.xlu1 %408 }
 0x28f   : > { %v410_v57 = vmax.f32 %v1005_v18, %v409_v56 }
 0x291   : > { %416 = vperm.xlu2 %845, %v410_v57   ;;  %v616_v1 = vsel %vm615_vm4, %v1008_v20, %v410_v57  ;;  %v411_v6 = vsub.f32 %v1005_v18, %v410_v57 }
 0x293   : > { %v412_v7 = vmul.f32 1.442695, %v411_v6 }
 0x299   : > { %847 = vset.pattern.permute.xlu2 %v924_v60 }
 0x29a   : > { %571 = vperm.xlu2 %847, %v1044_v59  }
 0x29d   : > { %v488_v62 = vpop.xlane.xlu2 %487 }
 0x29e   : > { %v489_v63 = vmax.f32 %v1005_v18, %v488_v62  ;;  %v370_v62 = vld [vmem:[#allocation4] sm:$0xff] }
 0x2a0   : > { %v490_v2 = vsub.f32 %v1005_v18, %v489_v63  ;;  %v618_v3 = vsel %vm617_vm5, %v616_v1, %v489_v63  ;;  %495 = vperm.xlu0 %846, %v489_v63  }
 0x2a1   : > { %v620_v4 = vsel %vm619_vm6, %v618_v3, %v1044_v59 }
 0x2a2   : > { %v491_v5 = vmul.f32 1.442695, %v490_v2  ;;  %622 = vst.msk [vmem:[#allocation2] sm:$0xff] %vm286_vm0, %v620_v4  ;;  %583 = vrot.lane.b32.xlu2 %v430_v52, %s919_s12  ;;  %v302_v52 = vld [vmem:[#allocation3] sm:$0xff] }
 0x2a3   : > { %848 = vset.pattern.permute.xlu2 %v921_v15 }
 0x2a4   : > { %858 = vpow2.f32 %v491_v5 }
 0x2a5   : > { %860 = vpow2.f32 %v412_v7 }
 0x2a6   : > { %v432_v11 = vpop.permute.xlu1 %431 }
 0x2a7   : > { %v437_v12 = vsel %vm353_vm3, %v432_v11, 0 }
 0x2a8   : > { %852 = vset.pattern.permute.xlu0 %v924_v60  ;;  %446 = vmatpush.bf16.msra.mxu3 %v437_v12 }
 0x2aa   : > { %v1062_v9 = vpop.eup %858  ;;  %373 = vperm.xlu2 %848, %v1060_v8  }
 0x2ab   : > { %530 = vperm.xlu1 %850, %v1062_v9   ;;  %v861_v10 = vpop.eup %860  ;;  %v501_v57 = vmul.f32 %v1062_v9, %v302_v52 }
 0x2ac   : > { %v422_v53 = vmul.f32 %v861_v10, %v302_v52 }
 0x2ae   : > { %v508_v20 = vpop.permute.xlu1 %507 }
 0x2af   : > { %v513_v24 = vsel %vm353_vm3, %v508_v20, 0 }
 0x2b0   : > { %522 = vmatpush.bf16.msrb.mxu3 %v513_v24 }
 0x2b2   : > { %849 = vset.pattern.permute.xlu2 %v922_v54  ;;  %v344_v54 = vmul.f32 %v1060_v8, %v302_v52 }
 0x2b3   : > { %454 = vperm.xlu2 %849, %v861_v10  }
 0x2bb   : > { %851 = vset.pattern.permute.xlu2 %v924_v60 }
 0x2d9   : > { %v347_v47 = vpop.xlane.xlu1 %346 }
 0x2da   : > { %v348_v58 = vadd.f32 %v347_v47, %v344_v54 }
 0x2eb   : > { %v417_v13 = vpop.permute.xlu2 %416 }
 0x2ec   : > { %v419_v14 = vsub.f32 %v1030_v43, %v417_v13  ;;  %v566_v43 = vsub.f32 %v1005_v18, %v1044_v59 }
 0x2ee   : > { %v420_v15 = vmul.f32 1.442695, %v419_v14  ;;  %v567_v44 = vmul.f32 1.442695, %v566_v43 }
 0x2f0   : > { %862 = vpow2.f32 %v420_v15 }
 0x2f4   : > { %v572_v16 = vpop.permute.xlu2 %571 }
 0x2f5   : > { %v574_v17 = vsub.f32 %v1023_v38, %v572_v16 }
 0x2f6   : > { %v863_v19 = vpop.eup %862 }
 0x2f7   : > { %v575_v21 = vmul.f32 1.442695, %v574_v17  ;;  %v423_v22 = vsel %vm328_vm2, %v863_v19, 0.0  ;;  %v427_v23 = vpack.c.bf16 %v863_v19, %v863_v19 }
 0x2f8   : > { %424 = vadd.xlane.f32.xlu0 %v423_v22 }
 0x2f9   : > { %864 = vpow2.f32 %v575_v21  ;;  %798 = vmatmul.msk.bf16.vlgmr.msra.gmra.mxu3 %vm328_vm2, %v427_v23 }
 0x2fc   : > { %v584_v25 = vpop.permute.xlu2 %583 }
 0x2fd   : > { %v589_v26 = vsel %vm353_vm3, %v584_v25, 0 }
 0x2fe   : > { %598 = vmatpush.bf16.msrb.mxu2 %v589_v26 }
 0x2ff   : > { %v865_v27 = vpop.eup %864 }
 0x300   : > { %v578_v28 = vsel %vm328_vm2, %v865_v27, 0.0  ;;  %v582_v29 = vpack.c.bf16 %v865_v27, %v865_v27 }
 0x301   : > { %579 = vadd.xlane.f32.xlu1 %v578_v28 }
 0x302   : > { %802 = vmatmul.msk.bf16.vlgmr.msrb.gmra.mxu2 %vm328_vm2, %v582_v29 }
 0x304   : > { %v374_v46 = vpop.permute.xlu2 %373 }
 0x305   : > { %v376_v3 = vmul.f32 %v374_v46, %v370_v62 }
 0x307   : > { %v377_v9 = vadd.f32 %v376_v3, %v1027_v41 }
 0x312   : > { %v496_v30 = vpop.permute.xlu0 %495 }
 0x313   : > { %v498_v31 = vsub.f32 %v1035_v48, %v496_v30  ;;  %v455_v48 = vpop.permute.xlu2 %454 }
 0x314   : > { %v457_v4 = vmul.f32 %v455_v48, %v370_v62 }
 0x315   : > { %v499_v32 = vmul.f32 1.442695, %v498_v31 }
 0x317   : > { %866 = vpow2.f32 %v499_v32 }
 0x318   : > { %868 = vpow2.f32 %v567_v44 }
 0x31d   : > { %v867_v33 = vpop.eup %866  ;;  %v531_v49 = vpop.permute.xlu1 %530 }
 0x31e   : > { %v506_v34 = vpack.c.bf16 %v867_v33, %v867_v33  ;;  %v502_v40 = vsel %vm328_vm2, %v867_v33, 0.0  ;;  %v869_v45 = vpop.eup %868  ;;  %v533_v5 = vmul.f32 %v531_v49, %v370_v62 }
 0x31f   : > { %v577_v18 = vmul.f32 %v869_v45, %v302_v52 }
 0x320   : > { %800 = vmatmul.msk.bf16.vlgmr.msrb.gmra.mxu3 %vm328_vm2, %v506_v34 }
 0x36b   : > { %v425_v50 = vpop.xlane.xlu0 %424 }
 0x36c   : > { %v426_v55 = vadd.f32 %v425_v50, %v422_v53 }
 0x36e   : > { %v623_v63 = vsel %vm615_vm4, %v348_v58, %v426_v55 }
 0x374   : > { %v580_v56 = vpop.xlane.xlu1 %579 }
 0x375   : > { %v581_v0 = vadd.f32 %v580_v56, %v577_v18 }
 0x37c   : > { %v448_v35 = vpop.f32.mrf.mxu3 }
 0x37d   : > { %459 = vrot.lane.b32.xlu2 %v448_v35, %s919_s12 }
 0x384   : > { %v450_v36 = vpop.f32.mrf.mxu3 }
 0x385   : > { %v600_v37 = vpop.f32.mrf.mxu2 }
 0x38d   : > { %v602_v38 = vpop.f32.mrf.mxu2 }
 0x3a3   : > { %v524_v39 = vpop.f32.mrf.mxu3 }
 0x3a4   : > { %535 = vrot.lane.b32.xlu0 %v524_v39, %s918_s11 }
 0x3a6   : > { %503 = vadd.xlane.f32.xlu2 %v502_v40 }
 0x3ab   : > { %v526_v42 = vpop.f32.mrf.mxu3 }
 0x3ac   : > { %611 = vrot.lane.b32.xlu0 %v600_v37, %s920_s13 }
 0x3be   : > { %606 = vperm.xlu2 %851, %v869_v45  }
 0x3d7   : > { %v460_v51 = vpop.permute.xlu2 %459 }
 0x3d8   : > { %v462_v6 = vadd.f32 %v460_v51, %v457_v4 }
 0x3da   : > { %v627_v12 = vsel %vm308_vm1, %v377_v9, %v462_v6 }
 0x416   : > { %v536_v59 = vpop.permute.xlu0 %535 }
 0x417   : > { %v538_v7 = vadd.f32 %v536_v59, %v533_v5 }
 0x419   : > { %v504_v60 = vpop.xlane.xlu2 %503  ;;  %v629_v14 = vsel %vm628_vm7, %v627_v12, %v538_v7 }
 0x41a   : > { %v505_v61 = vadd.f32 %v504_v60, %v501_v57 }
 0x41c   : > { %v624_v1 = vsel %vm617_vm5, %v623_v63, %v505_v61 }
 0x41d   : > { %v625_v2 = vsel %vm619_vm6, %v624_v1, %v581_v0 }
 0x41e   : > { %626 = vst.msk [vmem:[#allocation3] sm:$0xff] %vm286_vm0, %v625_v2  ;;  %v612_v11 = vpop.permute.xlu0 %611 }
 0x421   : > { %v607_v8 = vpop.permute.xlu2 %606 }
 0x422   : > { %v609_v10 = vmul.f32 %v607_v8, %v370_v62 }
 0x424   : > { %v614_v13 = vadd.f32 %v612_v11, %v609_v10 }
 0x426   : > { %v631_v15 = vsel %vm630_vm8, %v629_v14, %v614_v13 }
 0x427   : > { %632 = vst [vmem:[#allocation4] sm:$0xff] %v631_v15 }
 0x428 PF: > { %v925_v17 = vmov 0   ;;  %v926_v19 = vmov 2   ;;  %v927_v41 = vmov 1   ;;  %v928_v21 = vmov 3  }
 0x429   : > { %870 = vset.pattern.permute.xlu0 %v925_v17  ;;  %872 = vset.pattern.permute.xlu1 %v926_v19  ;;  %vm655_vm9 = vcmask 261120   ;;  %vm657_vm10 = vcmask 523264   ;;  %vm659_vm11 = vcmask 785408  }
 0x42a   : > { %v636_v16 = vld [vmem:[#allocation3] sm:$0xff] }
 0x42b   : > { %875 = vrcp.f32 %v636_v16 }
 0x42e   : > { %v661_v27 = vld [vmem:[#allocation4] sm:$0xff] }
 0x431   : > { %v876_v20 = vpop.eup %875 }
 0x432   : > { %640 = vperm.xlu0 %870, %v876_v20   ;;  %648 = vperm.xlu1 %872, %v876_v20  }
 0x43a   : > { %871 = vset.pattern.permute.xlu0 %v927_v41  ;;  %873 = vset.pattern.permute.xlu1 %v928_v21 }
 0x43b   : > { %644 = vperm.xlu0 %871, %v876_v20   ;;  %652 = vperm.xlu1 %873, %v876_v20  }
 0x443   : > { %874 = vset.pattern.permute.xlu0 %v928_v21 }
 0x4a4   : > { %v641_v22 = vpop.permute.xlu0 %640  ;;  %v649_v23 = vpop.permute.xlu1 %648 }
 0x4ad   : > { %v645_v24 = vpop.permute.xlu0 %644  ;;  %v653_v25 = vpop.permute.xlu1 %652 }
 0x4ae   : > { %v656_v26 = vsel %vm655_vm9, %v641_v22, %v645_v24 }
 0x4af   : > { %v658_v28 = vsel %vm657_vm10, %v656_v26, %v649_v23 }
 0x4b0   : > { %v660_v29 = vsel %vm659_vm11, %v658_v28, %v653_v25 }
 0x4b1   : > { %v662_v30 = vmul.f32 %v661_v27, %v660_v29 }
 0x4b3   : > { %v663_v31 = vpack.c.bf16 %v662_v30, %v662_v30 }
 0x4b5   : > { %664 = vst [vmem:[%s991_s10] sm:$0xf] %v663_v31 }
 0x4b6 PF: > { %s22_s21 = sadd.s32 1, %s913_s21   ;;  %s1106_s19 = smov %s909_s20 }
 0x4b7   : > { %p19_p6 = scmp.ge.s32.totalorder %s22_s21, 4   ;;  %s1107_s20 = smov %s1109_s0 }
 0x4b9   :  { %21 = sbr.rel (!%p19_p6) target bundleno = 8 (0x8), region = 80 }

// kernel: bert_layer_tp_forward.8
= control target key start
LH: loop header
LB: loop body
LE: loop exit
PB: predicated region body
PF: predicated region fallthrough
CT: control target
= control target key end

     0   :  { %s1346_s1 = inlined_call_operand.vmem [shape: bf16[128,512], index: 1, kind: input, shape index: {}]   ;;  %s1347_s0 = inlined_call_operand.vmem [shape: bf16[16,128], index: 0, kind: input, shape index: {}]   ;;  %s1348_s2 = inlined_call_operand.vmem [shape: f32[1,512], index: 2, kind: input, shape index: {}]   ;;  %s1349_s3 = inlined_call_operand.vmem [shape: bf16[16,512], index: 3, kind: output, shape index: {}]  }
   0x1   :  { %v817_v0 = vld [vmem:[%s1346_s1 + $0xe0] sm:$0xf]  ;;  %v870_v1 = vld [vmem:[%s1346_s1 + $0xec] sm:$0xf0]  ;;  %v868_v2 = vld [vmem:[%s1346_s1 + $0xe4] sm:$0xf] }
   0x2   :  { %v818_v3 = vor.u32 %v870_v1, %v817_v0  ;;  %v819_v4 = vld [vmem:[%s1346_s1 + $0xf0] sm:$0xf0]  ;;  %v825_v5 = vld [vmem:[%s1346_s1 + $0xe8] sm:$0xf]  ;;  %v871_v6 = vld [vmem:[%s1346_s1 + $0xf4] sm:$0xf0] }
   0x3   :  { %v822_v7 = vor.u32 %v868_v2, %v819_v4  ;;  %v826_v8 = vor.u32 %v871_v6, %v825_v5  ;;  %v869_v9 = vld [vmem:[%s1346_s1 + $0xec] sm:$0xf]  ;;  %v827_v10 = vld [vmem:[%s1346_s1 + $0xf8] sm:$0xf0]  ;;  %v801_v11 = vld [vmem:[%s1346_s1 + $0xc0] sm:$0xf] }
   0x4   :  { %234 = vmatpush.bf16.msra.mxu0 %v818_v3  ;;  %v830_v12 = vor.u32 %v869_v9, %v827_v10  ;;  %v866_v13 = vld [vmem:[%s1346_s1 + $0xcc] sm:$0xf0]  ;;  %v864_v14 = vld [vmem:[%s1346_s1 + $0xc4] sm:$0xf]  ;;  %v803_v15 = vld [vmem:[%s1346_s1 + $0xd0] sm:$0xf0] }
   0x5   :  { %248 = vmatpush.bf16.msra.mxu1 %v822_v7  ;;  %262 = vmatpush.bf16.msra.mxu2 %v826_v8  ;;  %v802_v16 = vor.u32 %v866_v13, %v801_v11  ;;  %v806_v17 = vor.u32 %v864_v14, %v803_v15  ;;  %v809_v18 = vld [vmem:[%s1346_s1 + $0xc8] sm:$0xf]  ;;  %v867_v19 = vld [vmem:[%s1346_s1 + $0xd4] sm:$0xf0]  ;;  %v865_v20 = vld [vmem:[%s1346_s1 + $0xcc] sm:$0xf] }
   0x6   :  { %276 = vmatpush.bf16.msra.mxu3 %v830_v12  ;;  %v810_v21 = vor.u32 %v867_v19, %v809_v18  ;;  %v811_v22 = vld [vmem:[%s1346_s1 + $0xd8] sm:$0xf0]  ;;  %v785_v23 = vld [vmem:[%s1346_s1 + $0xa0] sm:$0xf]  ;;  %v862_v24 = vld [vmem:[%s1346_s1 + $0xac] sm:$0xf0] }
   0x7   :  { %v814_v25 = vor.u32 %v865_v20, %v811_v22  ;;  %v860_v26 = vld [vmem:[%s1346_s1 + $0xa4] sm:$0xf]  ;;  %v787_v27 = vld [vmem:[%s1346_s1 + $0xb0] sm:$0xf0]  ;;  %v793_v28 = vld [vmem:[%s1346_s1 + $0xa8] sm:$0xf]  ;;  %v786_v29 = vor.u32 %v862_v24, %v785_v23 }
   0x8   :  { %235 = vmatpush.bf16.msra.mxu0 %v802_v16  ;;  %v863_v30 = vld [vmem:[%s1346_s1 + $0xb4] sm:$0xf0]  ;;  %v861_v31 = vld [vmem:[%s1346_s1 + $0xac] sm:$0xf]  ;;  %v795_v32 = vld [vmem:[%s1346_s1 + $0xb8] sm:$0xf0]  ;;  %v790_v33 = vor.u32 %v860_v26, %v787_v27 }
   0x9   :  { %249 = vmatpush.bf16.msra.mxu1 %v806_v17  ;;  %263 = vmatpush.bf16.msra.mxu2 %v810_v21  ;;  %v794_v34 = vor.u32 %v863_v30, %v793_v28  ;;  %v769_v35 = vld [vmem:[%s1346_s1 + $0x80] sm:$0xf]  ;;  %v858_v36 = vld [vmem:[%s1346_s1 + $0x8c] sm:$0xf0]  ;;  %v856_v37 = vld [vmem:[%s1346_s1 + $0x84] sm:$0xf]  ;;  %v798_v38 = vor.u32 %v861_v31, %v795_v32 }
   0xa   :  { %277 = vmatpush.bf16.msra.mxu3 %v814_v25  ;;  %v771_v39 = vld [vmem:[%s1346_s1 + $0x90] sm:$0xf0]  ;;  %v777_v40 = vld [vmem:[%s1346_s1 + $0x88] sm:$0xf]  ;;  %v859_v41 = vld [vmem:[%s1346_s1 + $0x94] sm:$0xf0]  ;;  %v770_v44 = vor.u32 %v858_v36, %v769_v35 }
   0xb   :  { %v857_v42 = vld [vmem:[%s1346_s1 + $0x8c] sm:$0xf]  ;;  %v779_v43 = vld [vmem:[%s1346_s1 + $0x98] sm:$0xf0]  ;;  %v774_v45 = vor.u32 %v856_v37, %v771_v39  ;;  %v778_v46 = vor.u32 %v859_v41, %v777_v40  ;;  %v753_v47 = vld [vmem:[%s1346_s1 + $0x60] sm:$0xf] }
   0xc   :  { %236 = vmatpush.bf16.msra.mxu0 %v786_v29  ;;  %v854_v48 = vld [vmem:[%s1346_s1 + $0x6c] sm:$0xf0]  ;;  %v852_v49 = vld [vmem:[%s1346_s1 + $0x64] sm:$0xf]  ;;  %v782_v50 = vor.u32 %v857_v42, %v779_v43  ;;  %v755_v51 = vld [vmem:[%s1346_s1 + $0x70] sm:$0xf0] }
   0xd   :  { %250 = vmatpush.bf16.msra.mxu1 %v790_v33  ;;  %264 = vmatpush.bf16.msra.mxu2 %v794_v34  ;;  %v761_v52 = vld [vmem:[%s1346_s1 + $0x68] sm:$0xf]  ;;  %v855_v53 = vld [vmem:[%s1346_s1 + $0x74] sm:$0xf0]  ;;  %v853_v54 = vld [vmem:[%s1346_s1 + $0x6c] sm:$0xf]  ;;  %v754_v56 = vor.u32 %v854_v48, %v753_v47  ;;  %v758_v57 = vor.u32 %v852_v49, %v755_v51 }
   0xe   :  { %278 = vmatpush.bf16.msra.mxu3 %v798_v38  ;;  %v763_v55 = vld [vmem:[%s1346_s1 + $0x78] sm:$0xf0]  ;;  %v762_v58 = vor.u32 %v855_v53, %v761_v52  ;;  %v737_v59 = vld [vmem:[%s1346_s1 + $0x40] sm:$0xf]  ;;  %v850_v60 = vld [vmem:[%s1346_s1 + $0x4c] sm:$0xf0] }
   0xf   :  { %v848_v61 = vld [vmem:[%s1346_s1 + $0x44] sm:$0xf]  ;;  %v766_v62 = vor.u32 %v853_v54, %v763_v55  ;;  %v739_v63 = vld [vmem:[%s1346_s1 + $0x50] sm:$0xf0]  ;;  %v745_v0 = vld [vmem:[%s1346_s1 + $0x48] sm:$0xf]  ;;  %v738_v4 = vor.u32 %v850_v60, %v737_v59 }
  0x10   :  { %237 = vmatpush.bf16.msra.mxu0 %v770_v44  ;;  %v851_v1 = vld [vmem:[%s1346_s1 + $0x54] sm:$0xf0]  ;;  %v849_v2 = vld [vmem:[%s1346_s1 + $0x4c] sm:$0xf]  ;;  %v747_v3 = vld [vmem:[%s1346_s1 + $0x58] sm:$0xf0]  ;;  %v742_v5 = vor.u32 %v848_v61, %v739_v63 }
  0x11   :  { %251 = vmatpush.bf16.msra.mxu1 %v774_v45  ;;  %265 = vmatpush.bf16.msra.mxu2 %v778_v46  ;;  %v746_v6 = vor.u32 %v851_v1, %v745_v0  ;;  %v721_v7 = vld [vmem:[%s1346_s1 + $0x20] sm:$0xf]  ;;  %v846_v8 = vld [vmem:[%s1346_s1 + $0x2c] sm:$0xf0]  ;;  %v844_v9 = vld [vmem:[%s1346_s1 + $0x24] sm:$0xf]  ;;  %v750_v10 = vor.u32 %v849_v2, %v747_v3 }
  0x12   :  { %279 = vmatpush.bf16.msra.mxu3 %v782_v50  ;;  %v723_v11 = vld [vmem:[%s1346_s1 + $0x30] sm:$0xf0]  ;;  %v729_v12 = vld [vmem:[%s1346_s1 + $0x28] sm:$0xf]  ;;  %v847_v13 = vld [vmem:[%s1346_s1 + $0x34] sm:$0xf0]  ;;  %v722_v16 = vor.u32 %v846_v8, %v721_v7 }
  0x13   :  { %v845_v14 = vld [vmem:[%s1346_s1 + $0x2c] sm:$0xf]  ;;  %v731_v15 = vld [vmem:[%s1346_s1 + $0x38] sm:$0xf0]  ;;  %v726_v17 = vor.u32 %v844_v9, %v723_v11  ;;  %v730_v18 = vor.u32 %v847_v13, %v729_v12  ;;  %v705_v19 = vld [vmem:[%s1346_s1] sm:$0xf] }
  0x14   :  { %238 = vmatpush.bf16.msra.mxu0 %v754_v56  ;;  %v842_v20 = vld [vmem:[%s1346_s1 + $0xc] sm:$0xf0]  ;;  %v840_v21 = vld [vmem:[%s1346_s1 + $0x4] sm:$0xf]  ;;  %v734_v22 = vor.u32 %v845_v14, %v731_v15  ;;  %v707_v23 = vld [vmem:[%s1346_s1 + $0x10] sm:$0xf0] }
  0x15   :  { %252 = vmatpush.bf16.msra.mxu1 %v758_v57  ;;  %266 = vmatpush.bf16.msra.mxu2 %v762_v58  ;;  %v713_v24 = vld [vmem:[%s1346_s1 + $0x8] sm:$0xf]  ;;  %v843_v25 = vld [vmem:[%s1346_s1 + $0x14] sm:$0xf0]  ;;  %v841_v26 = vld [vmem:[%s1346_s1 + $0xc] sm:$0xf]  ;;  %v706_v28 = vor.u32 %v842_v20, %v705_v19  ;;  %v710_v29 = vor.u32 %v840_v21, %v707_v23 }
  0x16   :  { %280 = vmatpush.bf16.msra.mxu3 %v766_v62  ;;  %v715_v27 = vld [vmem:[%s1346_s1 + $0x18] sm:$0xf0]  ;;  %v714_v30 = vor.u32 %v843_v25, %v713_v24  ;;  %v839_v32 = vld [vmem:[%s1347_s0] sm:$0xff] }
  0x17   :  { %v718_v31 = vor.u32 %v841_v26, %v715_v27  ;;  %v1106_v33 = vld [vmem:[%s1348_s2] sm:$0xf] }
  0x18   :  { %239 = vmatpush.bf16.msra.mxu0 %v738_v4  ;;  %v319_v34 = vperm.slane %v1106_v33, 0  ;;  %v320_v35 = vperm.slane %v1106_v33, 1  ;;  %v321_v42 = vperm.slane %v1106_v33, 2  ;;  %v322_v44 = vperm.slane %v1106_v33, 3 }
  0x19   :  { %253 = vmatpush.bf16.msra.mxu1 %v742_v5  ;;  %267 = vmatpush.bf16.msra.mxu2 %v746_v6 }
  0x1a   :  { %281 = vmatpush.bf16.msra.mxu3 %v750_v10 }
  0x1c   :  { %240 = vmatpush.bf16.msra.mxu0 %v722_v16 }
  0x1d   :  { %254 = vmatpush.bf16.msra.mxu1 %v726_v17  ;;  %268 = vmatpush.bf16.msra.mxu2 %v730_v18 }
  0x1e   :  { %282 = vmatpush.bf16.msra.mxu3 %v734_v22 }
  0x20   :  { %241 = vmatpush.bf16.msra.mxu0 %v706_v28 }
  0x21   :  { %255 = vmatpush.bf16.msra.mxu1 %v710_v29  ;;  %269 = vmatpush.bf16.msra.mxu2 %v714_v30 }
  0x22   :  { %283 = vmatpush.bf16.msra.mxu3 %v718_v31 }
  0x23   :  { %242 = vmatmul.bf16.vlgmr.msra.gmra.mxu0 %v839_v32 }
  0x24   :  { %256 = vmatmul.bf16.vlgmr.msra.gmra.mxu1 %v839_v32  ;;  %270 = vmatmul.bf16.vlgmr.msra.gmra.mxu2 %v839_v32 }
  0x25   :  { %284 = vmatmul.bf16.vlgmr.msra.gmra.mxu3 %v839_v32 }
  0xa0   :  { %v243_v36 = vpop.f32.mrf.mxu0 }
  0xa1   :  { %v1110_v37 = vadd.f32 %v319_v34, %v243_v36  ;;  %v257_v38 = vpop.f32.mrf.mxu1 }
  0xa2   :  { %v1114_v39 = vadd.f32 %v320_v35, %v257_v38 }
  0xa3   :  { %v1117_v40 = vmul.f32 0.70710677, %v1110_v37 }
  0xa4   :  { %v1120_v41 = vmul.f32 0.70710677, %v1114_v39 }
  0xa5   :  { %v351_v43 = vmul.f32 %v1117_v40, %v1117_v40 }
  0xa6   :  { %v391_v45 = vmul.f32 %v1120_v41, %v1120_v41 }
  0xa7   :  { %v1128_v46 = vmin.f32 %v351_v43, 16.0  ;;  %v271_v47 = vpop.f32.mrf.mxu2 }
  0xa8   :  { %v1130_v48 = vmin.f32 %v391_v45, 16.0  ;;  %v1134_v49 = vadd.f32 %v321_v42, %v271_v47  ;;  %v285_v50 = vpop.f32.mrf.mxu3  ;;  %v245_v59 = vpop.f32.mrf.mxu0 }
  0xa9   :  { %v353_v51 = vmul.f32 2.1237322e-06, %v1128_v46  ;;  %v364_v52 = vmul.f32 3.8918573e-05, %v1128_v46  ;;  %v1140_v53 = vadd.f32 %v322_v44, %v285_v50  ;;  %v1156_v4 = vadd.f32 %v319_v34, %v245_v59  ;;  %v259_v29 = vpop.f32.mrf.mxu1 }
  0xaa   :  { %v393_v54 = vmul.f32 2.1237322e-06, %v1130_v48  ;;  %v404_v55 = vmul.f32 3.8918573e-05, %v1130_v48  ;;  %v1145_v58 = vmul.f32 0.70710677, %v1134_v49 }
  0xab   :  { %v354_v56 = vadd.f32 0.00028619796, %v353_v51  ;;  %v365_v57 = vadd.f32 0.001143296, %v364_v52  ;;  %v1152_v1 = vmul.f32 0.70710677, %v1140_v53  ;;  %v1183_v51 = vadd.f32 %v320_v35, %v259_v29 }
  0xac   :  { %v394_v60 = vadd.f32 0.00028619796, %v393_v54  ;;  %v405_v61 = vadd.f32 0.001143296, %v404_v55  ;;  %v431_v0 = vmul.f32 %v1145_v58, %v1145_v58  ;;  %v1171_v18 = vmul.f32 0.70710677, %v1156_v4 }
  0xad   :  { %v355_v62 = vmul.f32 %v354_v56, %v1128_v46  ;;  %v366_v63 = vmul.f32 %v365_v57, %v1128_v46  ;;  %v471_v8 = vmul.f32 %v1152_v1, %v1152_v1 }
  0xae   :  { %v395_v2 = vmul.f32 %v394_v60, %v1130_v48  ;;  %v406_v3 = vmul.f32 %v405_v61, %v1130_v48  ;;  %v1158_v7 = vmin.f32 %v431_v0, 16.0  ;;  %v511_v56 = vmul.f32 %v1171_v18, %v1171_v18 }
  0xaf   :  { %v356_v5 = vadd.f32 0.0036580483, %v355_v62  ;;  %v367_v6 = vadd.f32 0.014752088, %v366_v63  ;;  %v1168_v17 = vmin.f32 %v471_v8, 16.0 }
  0xb0   :  { %v396_v9 = vadd.f32 0.0036580483, %v395_v2  ;;  %v407_v10 = vadd.f32 0.014752088, %v406_v3  ;;  %v433_v13 = vmul.f32 2.1237322e-06, %v1158_v7 }
  0xb1   :  { %v357_v11 = vmul.f32 %v356_v5, %v1128_v46  ;;  %v368_v12 = vmul.f32 %v367_v6, %v1128_v46  ;;  %v444_v14 = vmul.f32 3.8918573e-05, %v1158_v7  ;;  %v473_v28 = vmul.f32 2.1237322e-06, %v1168_v17 }
  0xb2   :  { %v397_v15 = vmul.f32 %v396_v9, %v1130_v48  ;;  %v408_v16 = vmul.f32 %v407_v10, %v1130_v48  ;;  %v434_v21 = vadd.f32 0.00028619796, %v433_v13  ;;  %v484_v34 = vmul.f32 3.8918573e-05, %v1168_v17 }
  0xb3   :  { %v358_v19 = vadd.f32 0.05243302, %v357_v11  ;;  %v369_v20 = vadd.f32 0.112945676, %v368_v12  ;;  %v445_v24 = vadd.f32 0.001143296, %v444_v14 }
  0xb4   :  { %v398_v22 = vadd.f32 0.05243302, %v397_v15  ;;  %v409_v23 = vadd.f32 0.112945676, %v408_v16  ;;  %v435_v27 = vmul.f32 %v434_v21, %v1158_v7  ;;  %v474_v55 = vadd.f32 0.00028619796, %v473_v28 }
  0xb5   :  { %v359_v25 = vmul.f32 %v358_v19, %v1128_v46  ;;  %v370_v26 = vmul.f32 %v369_v20, %v1128_v46  ;;  %v446_v32 = vmul.f32 %v445_v24, %v1158_v7  ;;  %v485_v61 = vadd.f32 0.001143296, %v484_v34 }
  0xb6   :  { %v399_v30 = vmul.f32 %v398_v22, %v1130_v48  ;;  %v410_v31 = vmul.f32 %v409_v23, %v1130_v48  ;;  %v436_v43 = vadd.f32 0.0036580483, %v435_v27  ;;  %v475_v3 = vmul.f32 %v474_v55, %v1168_v17 }
  0xb7   :  { %v360_v36 = vadd.f32 0.18741608, %v359_v25  ;;  %v371_v38 = vadd.f32 0.4994258, %v370_v26  ;;  %v447_v50 = vadd.f32 0.014752088, %v446_v32  ;;  %v486_v5 = vmul.f32 %v485_v61, %v1168_v17 }
  0xb8   :  { %v400_v45 = vadd.f32 0.18741608, %v399_v30  ;;  %v411_v47 = vadd.f32 0.4994258, %v410_v31  ;;  %v437_v54 = vmul.f32 %v436_v43, %v1158_v7  ;;  %v1197_v6 = vmin.f32 %v511_v56, 16.0 }
  0xb9   :  { %v372_v52 = vmul.f32 %v371_v38, %v1128_v46  ;;  %v361_v57 = vmul.f32 %v360_v36, %v1128_v46  ;;  %v448_v60 = vmul.f32 %v447_v50, %v1158_v7  ;;  %v1200_v46 = vmul.f32 0.70710677, %v1183_v51 }
  0xba   :  { %v412_v59 = vmul.f32 %v411_v47, %v1130_v48  ;;  %v401_v63 = vmul.f32 %v400_v45, %v1130_v48  ;;  %v438_v35 = vadd.f32 0.05243302, %v437_v54  ;;  %v476_v11 = vadd.f32 0.0036580483, %v475_v3 }
  0xbb   :  { %v373_v62 = vadd.f32 1.0, %v372_v52  ;;  %v449_v2 = vadd.f32 0.112945676, %v448_v60  ;;  %v362_v8 = vadd.f32 1.1283791, %v361_v57  ;;  %v1206_v13 = vmul.f32 0.5, %v1110_v37 }
  0xbc   :  { %v1193_v0 = vadd.f32 1.0, %v412_v59  ;;  %v402_v9 = vadd.f32 1.1283791, %v401_v63  ;;  %v439_v48 = vmul.f32 %v438_v35, %v1158_v7  ;;  %v487_v12 = vadd.f32 0.014752088, %v486_v5 }
  0xbd   :  { %872 = vrcp.f32 %v373_v62  ;;  %v450_v10 = vmul.f32 %v449_v2, %v1158_v7  ;;  %v383_v14 = vand.u32 2147483647, %v373_v62  ;;  %v513_v15 = vmul.f32 2.1237322e-06, %v1197_v6 }
  0xbe   :  { %874 = vrcp.f32 %v1193_v0  ;;  %v551_v16 = vmul.f32 %v1200_v46, %v1200_v46  ;;  %v363_v19 = vmul.f32 %v362_v8, %v1117_v40  ;;  %vm379_vm0 = vweird.f32 %v373_v62 }
  0xbf   :  { %v451_v20 = vadd.f32 0.4994258, %v450_v10  ;;  %v488_v21 = vmul.f32 %v487_v12, %v1168_v17  ;;  %v385_v23 = vand.u32 2147483648, %v373_v62  ;;  %v403_v24 = vmul.f32 %v402_v9, %v1120_v41 }
  0xc0   :  { %v440_v25 = vadd.f32 0.18741608, %v439_v48  ;;  %v524_v37 = vmul.f32 3.8918573e-05, %v1197_v6  ;;  %vm419_vm1 = vweird.f32 %v1193_v0  ;;  %v477_v29 = vmul.f32 %v476_v11, %v1168_v17  ;;  %v273_v48 = vpop.f32.mrf.mxu2 }
  0xc1   :  { %v452_v28 = vmul.f32 %v451_v20, %v1158_v7  ;;  %vm1218_vm2 = vcmp.eq.f32.partialorder %v383_v14, 8.507059e+37  ;;  %v489_v31 = vadd.f32 0.112945676, %v488_v21  ;;  %v514_v32 = vadd.f32 0.00028619796, %v513_v15 }
  0xc2   :  { %v423_v34 = vand.u32 2147483647, %v1193_v0  ;;  %v425_v36 = vand.u32 2147483648, %v1193_v0  ;;  %v441_v45 = vmul.f32 %v440_v25, %v1158_v7  ;;  %v525_v50 = vadd.f32 0.001143296, %v524_v37 }
  0xc3   :  { %v873_v22 = vpop.eup %872  ;;  %v1225_v38 = vadd.f32 1.0, %v452_v28  ;;  %v490_v47 = vmul.f32 %v489_v31, %v1168_v17  ;;  %v478_v54 = vadd.f32 0.05243302, %v477_v29  ;;  %v515_v57 = vmul.f32 %v514_v32, %v1197_v6 }
  0xc4   :  { %v875_v26 = vpop.eup %874  ;;  %v375_v27 = vmul.f32 %v873_v22, %v373_v62  ;;  %vm380_vm3 = vweird.f32 %v873_v22  ;;  %v386_v60 = vor.u32 1.1754944e-38, %v385_v23  ;;  %v526_v61 = vmul.f32 %v525_v50, %v1197_v6 }
  0xc5   :  { %v415_v30 = vmul.f32 %v875_v26, %v1193_v0  ;;  %876 = vrcp.f32 %v1225_v38  ;;  %vm420_vm4 = vweird.f32 %v875_v26  ;;  %v491_v56 = vadd.f32 0.4994258, %v490_v47  ;;  %vm381_vm5 = vmor %vm379_vm0, %vm380_vm3 }
  0xc6   :  { %v376_v41 = vsub.f32 1.0, %v375_v27  ;;  %v1232_v63 = vmin.f32 %v551_v16, 16.0  ;;  %vm424_vm6 = vcmp.eq.f32.partialorder %v423_v34, 8.507059e+37  ;;  %v426_v35 = vor.u32 1.1754944e-38, %v425_v36  ;;  %vm421_vm7 = vmor %vm419_vm1, %vm420_vm4 }
  0xc7   :  { %v416_v43 = vsub.f32 1.0, %v415_v30  ;;  %v492_v2 = vmul.f32 %v491_v56, %v1168_v17  ;;  %v442_v5 = vadd.f32 1.1283791, %v441_v45  ;;  %v479_v8 = vmul.f32 %v478_v54, %v1168_v17 }
  0xc8   :  { %v377_v52 = vmul.f32 %v873_v22, %v376_v41  ;;  %v527_v9 = vadd.f32 0.014752088, %v526_v61  ;;  %v516_v12 = vadd.f32 0.0036580483, %v515_v57  ;;  %v553_v0 = vmul.f32 2.1237322e-06, %v1232_v63 }
  0xc9   :  { %v417_v55 = vmul.f32 %v875_v26, %v416_v43  ;;  %v1241_v62 = vadd.f32 1.0, %v492_v2  ;;  %v336_v21 = vmul.f32 0.5, %v1114_v39  ;;  %v1249_v25 = vadd.f32 %v321_v42, %v273_v48 }
  0xca   :  { %v378_v59 = vadd.f32 %v873_v22, %v377_v52  ;;  %v528_v20 = vmul.f32 %v527_v9, %v1197_v6  ;;  %v480_v27 = vadd.f32 0.18741608, %v479_v8  ;;  %vm459_vm8 = vweird.f32 %v1225_v38  ;;  %v287_v8 = vpop.f32.mrf.mxu3 }
  0xcb   :  { %v418_v7 = vadd.f32 %v875_v26, %v417_v55  ;;  %v877_v14 = vpop.eup %876  ;;  %878 = vrcp.f32 %v1241_v62  ;;  %v465_v29 = vand.u32 2147483648, %v1225_v38  ;;  %v554_v30 = vadd.f32 0.00028619796, %v553_v0 }
  0xcc   :  { %v382_v3 = vsel %vm381_vm5, %v873_v22, %v378_v59  ;;  %v455_v23 = vmul.f32 %v877_v14, %v1225_v38  ;;  %v529_v40 = vadd.f32 0.112945676, %v528_v20  ;;  %vm460_vm9 = vweird.f32 %v877_v14 }
  0xcd   :  { %v387_v10 = vsel %vm1218_vm2, %v386_v60, %v382_v3  ;;  %v422_v11 = vsel %vm421_vm7, %v875_v26, %v418_v7  ;;  %v443_v26 = vmul.f32 %v442_v5, %v1145_v58  ;;  %v463_v32 = vand.u32 2147483647, %v1225_v38  ;;  %vm461_vm10 = vmor %vm459_vm8, %vm460_vm9 }
  0xce   :  { %v388_v15 = vmul.f32 %v387_v10, %v363_v19  ;;  %v427_v16 = vsel %vm424_vm6, %v426_v35, %v422_v11  ;;  %v456_v28 = vsub.f32 1.0, %v455_v23  ;;  %v481_v41 = vmul.f32 %v480_v27, %v1168_v17 }
  0xcf   :  { %v428_v22 = vmul.f32 %v427_v16, %v403_v24  ;;  %v517_v24 = vmul.f32 %v516_v12, %v1197_v6  ;;  %v530_v34 = vmul.f32 %v529_v40, %v1197_v6  ;;  %v564_v36 = vmul.f32 3.8918573e-05, %v1232_v63 }
  0xd0   :  { %v831_v37 = vclamps-f32 %v388_v15, 1.0  ;;  %v457_v42 = vmul.f32 %v877_v14, %v456_v28  ;;  %v466_v47 = vor.u32 1.1754944e-38, %v465_v29  ;;  %v1262_v50 = vmul.f32 0.70710677, %v1249_v25 }
  0xd1   :  { %v832_v19 = vclamps-f32 %v428_v22, 1.0  ;;  %v879_v52 = vpop.eup %878  ;;  %v518_v54 = vadd.f32 0.05243302, %v517_v24  ;;  %v531_v55 = vadd.f32 0.4994258, %v530_v34  ;;  %vm464_vm11 = vcmp.eq.f32.partialorder %v463_v32, 8.507059e+37 }
  0xd2   :  { %v671_v39 = vadd.f32 1.0, %v831_v37  ;;  %v458_v45 = vadd.f32 %v877_v14, %v457_v42  ;;  %v565_v56 = vadd.f32 0.001143296, %v564_v36  ;;  %v495_v59 = vmul.f32 %v879_v52, %v1241_v62 }
  0xd3   :  { %v672_v31 = vadd.f32 1.0, %v832_v19  ;;  %v482_v61 = vadd.f32 1.1283791, %v481_v41  ;;  %v503_v7 = vand.u32 2147483647, %v1241_v62  ;;  %v532_v35 = vmul.f32 %v531_v55, %v1197_v6 }
  0xd4   :  { %v679_v58 = vmul.f32 %v671_v39, %v1206_v13  ;;  %v555_v13 = vmul.f32 %v554_v30, %v1232_v63  ;;  %v462_v57 = vsel %vm461_vm10, %v877_v14, %v458_v45  ;;  %v496_v2 = vsub.f32 1.0, %v495_v59 }
  0xd5   :  { %v680_v43 = vmul.f32 %v672_v31, %v336_v21  ;;  %v467_v60 = vsel %vm464_vm11, %v466_v47, %v462_v57  ;;  %v566_v3 = vmul.f32 %v565_v56, %v1232_v63  ;;  %v591_v5 = vmul.f32 %v1262_v50, %v1262_v50 }
  0xd6   :  { %v468_v38 = vmul.f32 %v467_v60, %v443_v26  ;;  %v505_v9 = vand.u32 2147483648, %v1241_v62  ;;  %v519_v48 = vmul.f32 %v518_v54, %v1197_v6  ;;  %v1278_v10 = vadd.f32 1.0, %v532_v35 }
  0xd7   :  { %v687_v17 = vpack.c.bf16 %v680_v43, %v679_v58  ;;  %v556_v11 = vadd.f32 0.0036580483, %v555_v13  ;;  %v497_v12 = vmul.f32 %v879_v52, %v496_v2  ;;  %vm500_vm12 = vweird.f32 %v879_v52 }
  0xd8   :  { %v567_v14 = vadd.f32 0.014752088, %v566_v3  ;;  %v1280_v15 = vmin.f32 %v591_v5, 16.0  ;;  %v483_v16 = vmul.f32 %v482_v61, %v1152_v1  ;;  %880 = vrcp.f32 %v1278_v10 }
  0xd9   :  { %691 = vst [vmem:[%s1349_s3] sm:$0xff] %v687_v17  ;;  %v1286_v20 = vadd.f32 %v322_v44, %v287_v8  ;;  %v833_v0 = vclamps-f32 %v468_v38, 1.0  ;;  %v498_v21 = vadd.f32 %v879_v52, %v497_v12  ;;  %vm499_vm13 = vweird.f32 %v1241_v62 }
  0xda   :  { %v568_v22 = vmul.f32 %v567_v14, %v1232_v63  ;;  %vm501_vm14 = vmor %vm499_vm13, %vm500_vm12  ;;  %v506_v23 = vor.u32 1.1754944e-38, %v505_v9  ;;  %v557_v37 = vmul.f32 %v556_v11, %v1232_v63  ;;  %v593_v26 = vmul.f32 2.1237322e-06, %v1280_v15 }
  0xdb   :  { %v604_v1 = vmul.f32 3.8918573e-05, %v1280_v15  ;;  %v502_v27 = vsel %vm501_vm14, %v879_v52, %v498_v21  ;;  %vm504_vm15 = vcmp.eq.f32.partialorder %v503_v7, 8.507059e+37  ;;  %v520_v19 = vadd.f32 0.18741608, %v519_v48 }
  0xdc   :  { %v569_v33 = vadd.f32 0.112945676, %v568_v22  ;;  %v507_v44 = vsel %vm504_vm15, %v506_v23, %v502_v27  ;;  %v594_v28 = vadd.f32 0.00028619796, %v593_v26  ;;  %v1294_v39 = vmul.f32 0.70710677, %v1286_v20 }
  0xdd   :  { %v605_v29 = vadd.f32 0.001143296, %v604_v1  ;;  %v673_v62 = vadd.f32 1.0, %v833_v0  ;;  %v508_v24 = vmul.f32 %v507_v44, %v483_v16  ;;  %v558_v31 = vadd.f32 0.05243302, %v557_v37 }
  0xde   :  { %v570_v40 = vmul.f32 %v569_v33, %v1232_v63  ;;  %v881_v30 = vpop.eup %880  ;;  %v631_v32 = vmul.f32 %v1294_v39, %v1294_v39  ;;  %v337_v58 = vmul.f32 0.5, %v1134_v49  ;;  %v338_v41 = vmul.f32 0.5, %v1140_v53 }
  0xdf   :  { %v606_v42 = vmul.f32 %v605_v29, %v1280_v15  ;;  %v834_v34 = vclamps-f32 %v508_v24, 1.0  ;;  %v535_v36 = vmul.f32 %v881_v30, %v1278_v10  ;;  %v521_v43 = vmul.f32 %v520_v19, %v1197_v6 }
  0xe0   :  { %v571_v45 = vadd.f32 0.4994258, %v570_v40  ;;  %v595_v47 = vmul.f32 %v594_v28, %v1280_v15  ;;  %v681_v54 = vmul.f32 %v673_v62, %v337_v58  ;;  %v1305_v56 = vmin.f32 %v631_v32, 16.0 }
  0xe1   :  { %v607_v52 = vadd.f32 0.014752088, %v606_v42  ;;  %v674_v55 = vadd.f32 1.0, %v834_v34  ;;  %v536_v13 = vsub.f32 1.0, %v535_v36  ;;  %v545_v17 = vand.u32 2147483648, %v1278_v10 }
  0xe2   :  { %v559_v49 = vmul.f32 %v558_v31, %v1232_v63  ;;  %v572_v53 = vmul.f32 %v571_v45, %v1232_v63  ;;  %v633_v6 = vmul.f32 2.1237322e-06, %v1305_v56  ;;  %v644_v61 = vmul.f32 3.8918573e-05, %v1305_v56 }
  0xe3   :  { %v608_v57 = vmul.f32 %v607_v52, %v1280_v15  ;;  %v682_v59 = vmul.f32 %v674_v55, %v338_v41  ;;  %v537_v60 = vmul.f32 %v881_v30, %v536_v13  ;;  %vm540_vm0 = vweird.f32 %v881_v30 }
  0xe4   :  { %v573_v7 = vadd.f32 1.0, %v572_v53  ;;  %v596_v35 = vadd.f32 0.0036580483, %v595_v47  ;;  %v634_v5 = vadd.f32 0.00028619796, %v633_v6  ;;  %vm539_vm1 = vweird.f32 %v1278_v10 }
  0xe5   :  { %v609_v38 = vadd.f32 0.112945676, %v608_v57  ;;  %v688_v2 = vpack.c.bf16 %v682_v59, %v681_v54  ;;  %v538_v3 = vadd.f32 %v881_v30, %v537_v60  ;;  %v645_v8 = vadd.f32 0.001143296, %v644_v61  ;;  %vm541_vm2 = vmor %vm539_vm1, %vm540_vm0 }
  0xe6   :  { %v543_v9 = vand.u32 2147483647, %v1278_v10  ;;  %882 = vrcp.f32 %v573_v7  ;;  %v560_v48 = vadd.f32 0.18741608, %v559_v49  ;;  %v522_v12 = vadd.f32 1.1283791, %v521_v43 }
  0xe7   :  { %692 = vst [vmem:[%s1349_s3 + $0x8] sm:$0xff] %v688_v2  ;;  %v610_v11 = vmul.f32 %v609_v38, %v1280_v15  ;;  %v542_v14 = vsel %vm541_vm2, %v881_v30, %v538_v3  ;;  %v597_v16 = vmul.f32 %v596_v35, %v1280_v15  ;;  %v646_v0 = vmul.f32 %v645_v8, %v1305_v56 }
  0xe8   :  { %v546_v21 = vor.u32 1.1754944e-38, %v545_v17  ;;  %v635_v23 = vmul.f32 %v634_v5, %v1305_v56  ;;  %vm544_vm3 = vcmp.eq.f32.partialorder %v543_v9, 8.507059e+37  ;;  %v561_v26 = vmul.f32 %v560_v48, %v1232_v63 }
  0xe9   :  { %v611_v22 = vadd.f32 0.4994258, %v610_v11  ;;  %v647_v10 = vadd.f32 0.014752088, %v646_v0  ;;  %v523_v19 = vmul.f32 %v522_v12, %v1171_v18  ;;  %v598_v33 = vadd.f32 0.05243302, %v597_v16 }
  0xea   :  { %v547_v37 = vsel %vm544_vm3, %v546_v21, %v542_v14  ;;  %v636_v29 = vadd.f32 0.0036580483, %v635_v23  ;;  %v562_v30 = vadd.f32 1.1283791, %v561_v26  ;;  %v583_v42 = vand.u32 2147483647, %v573_v7 }
  0xeb   :  { %v612_v1 = vmul.f32 %v611_v22, %v1280_v15  ;;  %v648_v44 = vmul.f32 %v647_v10, %v1305_v56  ;;  %v548_v62 = vmul.f32 %v547_v37, %v523_v19  ;;  %v585_v32 = vand.u32 2147483648, %v573_v7 }
  0xec   :  { %v883_v27 = vpop.eup %882  ;;  %v599_v58 = vmul.f32 %v598_v33, %v1280_v15  ;;  %v637_v41 = vmul.f32 %v636_v29, %v1305_v56  ;;  %vm579_vm5 = vweird.f32 %v573_v7  ;;  %v563_v45 = vmul.f32 %v562_v30, %v1200_v46 }
  0xed   :  { %v575_v28 = vmul.f32 %v883_v27, %v573_v7  ;;  %v613_v24 = vadd.f32 1.0, %v612_v1  ;;  %v649_v40 = vadd.f32 0.112945676, %v648_v44  ;;  %vm580_vm4 = vweird.f32 %v883_v27 }
  0xee   :  { %v835_v34 = vclamps-f32 %v548_v62, 1.0  ;;  %vm581_vm6 = vmor %vm579_vm5, %vm580_vm4  ;;  %v586_v47 = vor.u32 1.1754944e-38, %v585_v32  ;;  %v600_v52 = vadd.f32 0.18741608, %v599_v58  ;;  %vm584_vm7 = vcmp.eq.f32.partialorder %v583_v42, 8.507059e+37 }
  0xef   :  { %v576_v31 = vsub.f32 1.0, %v575_v28  ;;  %884 = vrcp.f32 %v613_v24  ;;  %v650_v18 = vmul.f32 %v649_v40, %v1305_v56  ;;  %v638_v55 = vadd.f32 0.05243302, %v637_v41 }
  0xf0   :  { %v675_v49 = vadd.f32 1.0, %v835_v34  ;;  %v339_v60 = vmul.f32 0.5, %v1156_v4  ;;  %v601_v6 = vmul.f32 %v600_v52, %v1280_v15  ;;  %v340_v2 = vmul.f32 0.5, %v1183_v51 }
  0xf1   :  { %v577_v63 = vmul.f32 %v883_v27, %v576_v31  ;;  %v651_v43 = vadd.f32 0.4994258, %v650_v18  ;;  %v639_v35 = vmul.f32 %v638_v55, %v1305_v56  ;;  %v625_v3 = vand.u32 2147483648, %v613_v24 }
  0xf2   :  { %v683_v38 = vmul.f32 %v675_v49, %v339_v60  ;;  %v623_v9 = vand.u32 2147483647, %v613_v24  ;;  %v602_v48 = vadd.f32 1.1283791, %v601_v6  ;;  %vm619_vm9 = vweird.f32 %v613_v24 }
  0xf3   :  { %v578_v36 = vadd.f32 %v883_v27, %v577_v63  ;;  %v652_v13 = vmul.f32 %v651_v43, %v1305_v56  ;;  %v640_v4 = vadd.f32 0.18741608, %v639_v35  ;;  %v626_v15 = vor.u32 1.1754944e-38, %v625_v3 }
  0xf4   :  { %vm624_vm11 = vcmp.eq.f32.partialorder %v623_v9, 8.507059e+37  ;;  %v603_v51 = vmul.f32 %v602_v48, %v1262_v50  ;;  %v341_v40 = vmul.f32 0.5, %v1249_v25  ;;  %v342_v42 = vmul.f32 0.5, %v1286_v20 }
  0xf5   :  { %v582_v54 = vsel %vm581_vm6, %v883_v27, %v578_v36  ;;  %v885_v17 = vpop.eup %884  ;;  %v653_v61 = vadd.f32 1.0, %v652_v13  ;;  %v641_v22 = vmul.f32 %v640_v4, %v1305_v56 }
  0xf6   :  { %v587_v53 = vsel %vm584_vm7, %v586_v47, %v582_v54  ;;  %v615_v59 = vmul.f32 %v885_v17, %v613_v24  ;;  %vm620_vm8 = vweird.f32 %v885_v17 }
  0xf7   :  { %v588_v57 = vmul.f32 %v587_v53, %v563_v45  ;;  %886 = vrcp.f32 %v653_v61  ;;  %vm621_vm10 = vmor %vm619_vm9, %vm620_vm8  ;;  %v665_v26 = vand.u32 2147483648, %v653_v61  ;;  %v642_v1 = vadd.f32 1.1283791, %v641_v22 }
  0xf8   :  { %v616_v46 = vsub.f32 1.0, %v615_v59  ;;  %v663_v19 = vand.u32 2147483647, %v653_v61  ;;  %vm659_vm13 = vweird.f32 %v653_v61 }
  0xf9   :  { %v836_v7 = vclamps-f32 %v588_v57, 1.0  ;;  %v666_v28 = vor.u32 1.1754944e-38, %v665_v26  ;;  %v643_v29 = vmul.f32 %v642_v1, %v1294_v39 }
  0xfa   :  { %v617_v8 = vmul.f32 %v885_v17, %v616_v46  ;;  %vm664_vm15 = vcmp.eq.f32.partialorder %v663_v19, 8.507059e+37 }
  0xfb   :  { %v676_v5 = vadd.f32 1.0, %v836_v7 }
  0xfc   :  { %v618_v12 = vadd.f32 %v885_v17, %v617_v8 }
  0xfd   :  { %v684_v11 = vmul.f32 %v676_v5, %v340_v2  ;;  %v887_v0 = vpop.eup %886 }
  0xfe   :  { %v622_v16 = vsel %vm621_vm10, %v885_v17, %v618_v12  ;;  %v655_v23 = vmul.f32 %v887_v0, %v653_v61  ;;  %vm660_vm12 = vweird.f32 %v887_v0 }
  0xff   :  { %v689_v14 = vpack.c.bf16 %v684_v11, %v683_v38  ;;  %v627_v21 = vsel %vm624_vm11, %v626_v15, %v622_v16  ;;  %vm661_vm14 = vmor %vm659_vm13, %vm660_vm12 }
 0x100   :  { %v628_v10 = vmul.f32 %v627_v21, %v603_v51  ;;  %v656_v37 = vsub.f32 1.0, %v655_v23 }
 0x101   :  { %693 = vst [vmem:[%s1349_s3 + $0x10] sm:$0xff] %v689_v14 }
 0x102   :  { %v657_v27 = vmul.f32 %v887_v0, %v656_v37  ;;  %v837_v33 = vclamps-f32 %v628_v10, 1.0 }
 0x104   :  { %v658_v44 = vadd.f32 %v887_v0, %v657_v27  ;;  %v677_v24 = vadd.f32 1.0, %v837_v33 }
 0x106   :  { %v662_v62 = vsel %vm661_vm14, %v887_v0, %v658_v44  ;;  %v685_v31 = vmul.f32 %v677_v24, %v341_v40 }
 0x107   :  { %v667_v50 = vsel %vm664_vm15, %v666_v28, %v662_v62 }
 0x108   :  { %v668_v56 = vmul.f32 %v667_v50, %v643_v29 }
 0x10a   :  { %v838_v30 = vclamps-f32 %v668_v56, 1.0 }
 0x10c   :  { %v678_v32 = vadd.f32 1.0, %v838_v30 }
 0x10e   :  { %v686_v58 = vmul.f32 %v678_v32, %v342_v42 }
 0x110   :  { %v690_v63 = vpack.c.bf16 %v686_v58, %v685_v31 }
 0x112   :  { %694 = vst [vmem:[%s1349_s3 + $0x18] sm:$0xff] %v690_v63 }

// kernel: bert_layer_tp_forward.9
= control target key start
LH: loop header
LB: loop body
LE: loop exit
PB: predicated region body
PF: predicated region fallthrough
CT: control target
= control target key end

     0   :  { %s871_s0 = inlined_call_operand.vmem [shape: bf16[16,512], index: 0, kind: input, shape index: {}]   ;;  %s872_s1 = inlined_call_operand.vmem [shape: bf16[512,128], index: 1, kind: input, shape index: {}]   ;;  %s873_s2 = inlined_call_operand.vmem [shape: f32[1,128], index: 2, kind: input, shape index: {}]   ;;  %s874_s3 = inlined_call_operand.vmem [shape: bf16[16,128], index: 3, kind: input, shape index: {}]   ;;  %s875_s4 = inlined_call_operand.vmem [shape: f32[1,128], index: 4, kind: input, shape index: {}]   ;;  %s876_s5 = inlined_call_operand.vmem [shape: f32[1,128], index: 5, kind: input, shape index: {}]   ;;  %s877_s6 = inlined_call_operand.hbm [shape: f32[16,128], index: 6, kind: output, shape index: {}]  }
   0x1   :  { %v629_v0 = vld [vmem:[%s872_s1 + $0x38] sm:$0xff]  ;;  %v628_v4 = vld [vmem:[%s872_s1 + $0x30] sm:$0xff]  ;;  %v627_v8 = vld [vmem:[%s872_s1 + $0x28] sm:$0xff] }
   0x2   :  { %v637_v1 = vld [vmem:[%s872_s1 + $0x78] sm:$0xff]  ;;  %312 = vmatpush.bf16.msra.mxu0 %v629_v0  ;;  %v636_v5 = vld [vmem:[%s872_s1 + $0x70] sm:$0xff]  ;;  %v635_v9 = vld [vmem:[%s872_s1 + $0x68] sm:$0xff] }
   0x3   :  { %v645_v2 = vld [vmem:[%s872_s1 + $0xb8] sm:$0xff]  ;;  %326 = vmatpush.bf16.msra.mxu1 %v637_v1  ;;  %v644_v6 = vld [vmem:[%s872_s1 + $0xb0] sm:$0xff]  ;;  %v643_v10 = vld [vmem:[%s872_s1 + $0xa8] sm:$0xff] }
   0x4   :  { %v653_v3 = vld [vmem:[%s872_s1 + $0xf8] sm:$0xff]  ;;  %340 = vmatpush.bf16.msra.mxu2 %v645_v2  ;;  %v652_v7 = vld [vmem:[%s872_s1 + $0xf0] sm:$0xff]  ;;  %v651_v11 = vld [vmem:[%s872_s1 + $0xe8] sm:$0xff] }
   0x5   :  { %354 = vmatpush.bf16.msra.mxu3 %v653_v3  ;;  %v626_v12 = vld [vmem:[%s872_s1 + $0x20] sm:$0xff]  ;;  %v625_v16 = vld [vmem:[%s872_s1 + $0x18] sm:$0xff] }
   0x6   :  { %313 = vmatpush.bf16.msra.mxu0 %v628_v4  ;;  %v634_v13 = vld [vmem:[%s872_s1 + $0x60] sm:$0xff] }
   0x7   :  { %327 = vmatpush.bf16.msra.mxu1 %v636_v5  ;;  %v642_v14 = vld [vmem:[%s872_s1 + $0xa0] sm:$0xff] }
   0x8   :  { %341 = vmatpush.bf16.msra.mxu2 %v644_v6  ;;  %v650_v15 = vld [vmem:[%s872_s1 + $0xe0] sm:$0xff] }
   0x9   :  { %355 = vmatpush.bf16.msra.mxu3 %v652_v7 }
   0xa   :  { %314 = vmatpush.bf16.msra.mxu0 %v627_v8 }
   0xb   :  { %328 = vmatpush.bf16.msra.mxu1 %v635_v9 }
   0xc   :  { %342 = vmatpush.bf16.msra.mxu2 %v643_v10 }
   0xd   :  { %356 = vmatpush.bf16.msra.mxu3 %v651_v11 }
   0xe   :  { %11 = vsyncpa [#allocation4], 0  ;;  %315 = vmatpush.bf16.msra.mxu0 %v626_v12  ;;  %v633_v17 = vld [vmem:[%s872_s1 + $0x58] sm:$0xff]  ;;  %v624_v20 = vld [vmem:[%s872_s1 + $0x10] sm:$0xff]  ;;  %v697_v4 = vmov 128.0   ;;  %s462_s12 = sshll.u32 %s877_s6, 4  ;;  %s463_s12 = int_to_ptr.hbm [resolvable:$true] %s462_s12 }
   0xf   :  { %329 = vmatpush.bf16.msra.mxu1 %v634_v13  ;;  %v641_v18 = vld [vmem:[%s872_s1 + $0x98] sm:$0xff]  ;;  %v632_v21 = vld [vmem:[%s872_s1 + $0x50] sm:$0xff]  ;;  %v623_v24 = vld [vmem:[%s872_s1 + $0x8] sm:$0xff]  ;;  %665 = vrcp.f32 %v697_v4  ;;  %s700_s13 = smov 8  }
  0x10   :  { %343 = vmatpush.bf16.msra.mxu2 %v642_v14  ;;  %v649_v19 = vld [vmem:[%s872_s1 + $0xd8] sm:$0xff]  ;;  %v640_v22 = vld [vmem:[%s872_s1 + $0x90] sm:$0xff]  ;;  %v631_v25 = vld [vmem:[%s872_s1 + $0x48] sm:$0xff] }
  0x11   :  { %357 = vmatpush.bf16.msra.mxu3 %v650_v15  ;;  %v648_v23 = vld [vmem:[%s872_s1 + $0xd0] sm:$0xff]  ;;  %v639_v26 = vld [vmem:[%s872_s1 + $0x88] sm:$0xff]  ;;  %v622_v28 = vld [vmem:[%s872_s1] sm:$0xff] }
  0x12   :  { %316 = vmatpush.bf16.msra.mxu0 %v625_v16  ;;  %v647_v27 = vld [vmem:[%s872_s1 + $0xc8] sm:$0xff]  ;;  %v630_v29 = vld [vmem:[%s872_s1 + $0x40] sm:$0xff]  ;;  %v620_v33 = vld [vmem:[%s871_s0 + $0xc] sm:$0xf0] }
  0x13   :  { %330 = vmatpush.bf16.msra.mxu1 %v633_v17  ;;  %v638_v30 = vld [vmem:[%s872_s1 + $0x80] sm:$0xff]  ;;  %v478_v35 = vld [vmem:[%s871_s0 + $0x10] sm:$0xf0]  ;;  %v484_v36 = vld [vmem:[%s871_s0 + $0x8] sm:$0xf] }
  0x14   :  { %344 = vmatpush.bf16.msra.mxu2 %v641_v18  ;;  %v646_v31 = vld [vmem:[%s872_s1 + $0xc0] sm:$0xff]  ;;  %v621_v37 = vld [vmem:[%s871_s0 + $0x14] sm:$0xf0]  ;;  %v619_v38 = vld [vmem:[%s871_s0 + $0xc] sm:$0xf] }
  0x15   :  { %358 = vmatpush.bf16.msra.mxu3 %v649_v19  ;;  %v476_v32 = vld [vmem:[%s871_s0] sm:$0xf]  ;;  %v618_v34 = vld [vmem:[%s871_s0 + $0x4] sm:$0xf]  ;;  %v486_v39 = vld [vmem:[%s871_s0 + $0x18] sm:$0xf0]  ;;  %v485_v42 = vor.u32 %v621_v37, %v484_v36  ;;  %v666_v5 = vpop.eup %665 }
  0x16   :  { %317 = vmatpush.bf16.msra.mxu0 %v624_v20  ;;  %v477_v40 = vor.u32 %v620_v33, %v476_v32  ;;  %v481_v41 = vor.u32 %v618_v34, %v478_v35  ;;  %v489_v43 = vor.u32 %v619_v38, %v486_v39  ;;  %v655_v49 = vld [vmem:[%s874_s3] sm:$0xff]   ;;  %v394_v6 = vmul.f32 128.0, %v666_v5 }
  0x17   :  { %331 = vmatpush.bf16.msra.mxu1 %v632_v21  ;;  %v662_v51 = vld [vmem:[%s873_s2] ss:$0 sm:$0xff]  ;;  %v656_v53 = vunpack.c.l.bf16 %v655_v49  ;;  %v657_v0 = vunpack.c.h.bf16 %v655_v49  ;;  %vm398_vm0 = vweird.f32 %v666_v5 }
  0x18   :  { %345 = vmatpush.bf16.msra.mxu2 %v640_v22  ;;  %v395_v7 = vsub.f32 1.0, %v394_v6  ;;  %v663_v36 = vld [vmem:[%s875_s4] ss:$0 sm:$0xff]  ;;  %s698_s4 = smov [#allocation3]  }
  0x19   :  { %359 = vmatpush.bf16.msra.mxu3 %v648_v23  ;;  %s460_s9 = sshll.u32 %s698_s4, 4  ;;  %s461_s9 = int_to_ptr.vmem [resolvable:$true] %s460_s9 }
  0x1a   :  { %318 = vmatpush.bf16.msra.mxu0 %v623_v24  ;;  %v396_v8 = vmul.f32 %v666_v5, %v395_v7 }
  0x1b   :  { %332 = vmatpush.bf16.msra.mxu1 %v631_v25 }
  0x1c   :  { %346 = vmatpush.bf16.msra.mxu2 %v639_v26  ;;  %v397_v9 = vadd.f32 %v666_v5, %v396_v8 }
  0x1d   :  { %360 = vmatpush.bf16.msra.mxu3 %v647_v27 }
  0x1e   :  { %319 = vmatpush.bf16.msra.mxu0 %v622_v28  ;;  %v399_v10 = vsel %vm398_vm0, %v666_v5, %v397_v9 }
  0x1f   :  { %333 = vmatpush.bf16.msra.mxu1 %v630_v29 }
  0x20   :  { %347 = vmatpush.bf16.msra.mxu2 %v638_v30 }
  0x21   :  { %361 = vmatpush.bf16.msra.mxu3 %v646_v31  ;;  %320 = vmatmul.bf16.vlgmr.msra.gmra.mxu0 %v477_v40  ;;  %v664_v40 = vld [vmem:[%s876_s5] ss:$0 sm:$0xff]  ;;  %s699_s5 = smov 128  }
  0x22   :  { %334 = vmatmul.bf16.vlgmr.msra.gmra.mxu1 %v481_v41 }
  0x23   :  { %348 = vmatmul.bf16.vlgmr.msra.gmra.mxu2 %v485_v42 }
  0x24   :  { %362 = vmatmul.bf16.vlgmr.msra.gmra.mxu3 %v489_v43 }
  0x9e   :  { %v321_v44 = vpop.f32.mrf.mxu0 }
  0x9f   :  { %v335_v45 = vpop.f32.mrf.mxu1 }
  0xa0   :  { %v336_v46 = vadd.f32 %v335_v45, %v321_v44 }
  0xa6   :  { %v349_v47 = vpop.f32.mrf.mxu2  ;;  %v323_v54 = vpop.f32.mrf.mxu0 }
  0xa7   :  { %v363_v48 = vpop.f32.mrf.mxu3  ;;  %v350_v50 = vadd.f32 %v349_v47, %v336_v46  ;;  %v337_v55 = vpop.f32.mrf.mxu1 }
  0xa8   :  { %v338_v57 = vadd.f32 %v337_v55, %v323_v54 }
  0xa9   :  { %v364_v52 = vadd.f32 %v363_v48, %v350_v50 }
  0xab   :  { %v381_v56 = vadd.f32 %v662_v51, %v364_v52 }
  0xad   :  { %v387_v58 = vadd.f32 %v656_v53, %v381_v56 }
  0xae   :  { %v351_v59 = vpop.f32.mrf.mxu2 }
  0xaf   :  { %v352_v60 = vadd.f32 %v351_v59, %v338_v57  ;;  %389 = vadd.xlane.f32.xlu0 %v387_v58  ;;  %v402_v61 = vmul.f32 %v387_v58, %v387_v58  ;;  %v365_v62 = vpop.f32.mrf.mxu3 }
  0xb1   :  { %v366_v63 = vadd.f32 %v365_v62, %v352_v60  ;;  %404 = vadd.xlane.f32.xlu1 %v402_v61 }
  0xb3   :  { %v382_v1 = vadd.f32 %v662_v51, %v366_v63 }
  0xb5   :  { %v388_v2 = vadd.f32 %v657_v0, %v382_v1 }
  0xb7   :  { %391 = vadd.xlane.f32.xlu0 %v388_v2  ;;  %v403_v3 = vmul.f32 %v388_v2, %v388_v2 }
  0xb9   :  { %406 = vadd.xlane.f32.xlu1 %v403_v3 }
 0x122   :  { %v390_v11 = vpop.xlane.xlu0 %389 }
 0x123   :  { %v400_v12 = vmul.f32 %v399_v10, %v390_v11 }
 0x124   :  { %v405_v13 = vpop.xlane.xlu1 %404 }
 0x125   :  { %v410_v14 = vmul.f32 %v400_v12, %v400_v12  ;;  %v408_v15 = vmul.f32 %v405_v13, %v399_v10  ;;  %v416_v34 = vsub.f32 %v387_v58, %v400_v12 }
 0x127   :  { %v412_v16 = vsub.f32 %v408_v15, %v410_v14 }
 0x129   :  { %v414_v17 = vmax.f32 %v412_v16, 0.0 }
 0x12a   :  { %v392_v18 = vpop.xlane.xlu0 %391 }
 0x12b   :  { %v418_v19 = vadd.f32 1e-12, %v414_v17  ;;  %v401_v20 = vmul.f32 %v399_v10, %v392_v18 }
 0x12c   :  { %v407_v21 = vpop.xlane.xlu1 %406 }
 0x12d   :  { %667 = vrsqrt.f32 %v418_v19  ;;  %v411_v22 = vmul.f32 %v401_v20, %v401_v20  ;;  %v409_v23 = vmul.f32 %v407_v21, %v399_v10  ;;  %vm426_vm2 = vweird.f32 %v418_v19 }
 0x12e   :  { %v417_v46 = vsub.f32 %v388_v2, %v401_v20 }
 0x12f   :  { %v413_v24 = vsub.f32 %v409_v23, %v411_v22 }
 0x131   :  { %v415_v25 = vmax.f32 %v413_v24, 0.0 }
 0x133   :  { %v668_v26 = vpop.eup %667  ;;  %v419_v28 = vadd.f32 1e-12, %v415_v25 }
 0x134   :  { %v421_v27 = vmul.f32 %v668_v26, %v418_v19  ;;  %vm427_vm1 = vweird.f32 %v668_v26 }
 0x135   :  { %669 = vrsqrt.f32 %v419_v28  ;;  %vm428_vm3 = vmor %vm426_vm2, %vm427_vm1  ;;  %vm436_vm5 = vweird.f32 %v419_v28 }
 0x136   :  { %v422_v29 = vmul.f32 %v668_v26, %v421_v27 }
 0x138   :  { %v423_v30 = vmul.f32 0.5, %v422_v29 }
 0x13a   :  { %v424_v31 = vsub.f32 1.5, %v423_v30 }
 0x13b   :  { %v670_v32 = vpop.eup %669 }
 0x13c   :  { %v425_v33 = vmul.f32 %v668_v26, %v424_v31  ;;  %v431_v35 = vmul.f32 %v670_v32, %v419_v28  ;;  %vm437_vm4 = vweird.f32 %v670_v32 }
 0x13d   :  { %vm438_vm6 = vmor %vm436_vm5, %vm437_vm4 }
 0x13e   :  { %v429_v37 = vsel %vm428_vm3, %v668_v26, %v425_v33  ;;  %v432_v39 = vmul.f32 %v670_v32, %v431_v35 }
 0x13f   :  { %v440_v38 = vmul.f32 %v429_v37, %v416_v34 }
 0x140   :  { %v433_v41 = vmul.f32 0.5, %v432_v39 }
 0x141   :  { %v446_v42 = vmul.f32 %v663_v36, %v440_v38 }
 0x142   :  { %v434_v43 = vsub.f32 1.5, %v433_v41 }
 0x143   :  { %v452_v44 = vadd.f32 %v664_v40, %v446_v42 }
 0x144   :  { %v435_v45 = vmul.f32 %v670_v32, %v434_v43 }
 0x145   :  { %454 = vst [vmem:[#allocation3] sm:$0xff] %v452_v44 }
 0x146   :  { %v439_v47 = vsel %vm438_vm6, %v670_v32, %v435_v45 }
 0x147   :  { %v441_v48 = vmul.f32 %v439_v47, %v417_v46 }
 0x149   :  { %v447_v49 = vmul.f32 %v663_v36, %v441_v48 }
 0x14b   :  { %v453_v50 = vadd.f32 %v664_v40, %v447_v49 }
 0x14d   :  { %455 = vst [vmem:[#allocation3 + $0x8] sm:$0xff] %v453_v50 }
 0x14e   :  { %468 = dma.vmem_to_hbm [thread:$0]  %s461_s9, 256, %s463_s12, [#allocation4], %s699_s5, %s699_s5, %s700_s13  }
 0x14f   :  { %695 = dma.done.wait [#allocation4], 256  }
 0x150   :  { %696 = vsyncadd [#allocation4], 4294967040 }
 0x151   :  { %473 = vsyncpa [#allocation4], 1 }

</bundles_post_ra>
